<compile_context>
chip_gen: v7x
topology: tpu7x:2x2x1
jax: 0.10.0
libtpu: 0.0.40
codegen_flags: <defaults>
</compile_context>

<pallas_src>
import functools

import jax
import jax.numpy as jnp
from jax import lax
from jax.experimental import pallas as pl
from jax.experimental.pallas import tpu as pltpu

LANE = 128


def _round_up(x, m):
    return ((x + m - 1) // m) * m


def _vmem_limit_bytes():
    """Per-generation scoped-VMEM request (raise on v5e/v6e, stay under v7x's 64 MiB)."""
    try:
        kind = jax.devices()[0].device_kind.lower()
    except Exception:
        kind = ""
    if "v7" in kind:
        return 44 * 1024 * 1024          # 64 MiB/TensorCore physical on v7x
    if any(t in kind for t in ("v5 lite", "v5e", "v5litepod", "v6")):
        return 80 * 1024 * 1024          # 128 MiB physical on v5e/v6e
    return 32 * 1024 * 1024              # conservative default for other gens


# ----------------------------------------------------------------------------
# Kernel: one fused matmul + gated epilogue + BN partial statistics per grid step.
#   x_ref  : (tile_m, K)   bf16   im2col rows (original resolution)
#   w_ref  : (K, 2P)       bf16   [4 sub-pixel feature sets | 4 gating sets]
#   b_ref  : (1, 2P)       f32
#   y_ref  : (tile_m, P)   bf16   gated activations (lane-dense)
#   sum/sq : (1, P)        f32    per-tile BN partials
# ----------------------------------------------------------------------------
def gated_conv_kernel(x_ref, w_ref, b_ref, y_ref, sum_ref, sq_ref, *,
                      p_lanes, neg_slope):
    acc = jnp.dot(x_ref[...], w_ref[...], preferred_element_type=jnp.float32)
    acc = acc + b_ref[...]                       # (tile_m, 2P) f32

    feat = acc[:, :p_lanes]
    gate = acc[:, p_lanes:]
    act = jnp.where(feat >= 0, feat, neg_slope * feat)      # LeakyReLU(neg_slope)
    y = act * jax.nn.sigmoid(gate)                           # (tile_m, P) f32

    yb = y.astype(y_ref.dtype)                               # bf16, lane-dense store
    y_ref[...] = yb

    # BN batch statistics: unmasked per-tile partials (pad rows corrected in glue),
    # computed on exactly the bf16 values that were stored.
    yf = yb.astype(jnp.float32)
    sum_ref[...] = jnp.sum(yf, axis=0, keepdims=True)
    sq_ref[...] = jnp.sum(yf * yf, axis=0, keepdims=True)


def gated_up_conv2d(x_nchw, params, *, scale_factor=2, padding=1,
                    neg_slope=0.2, eps=1e-5, tile_m=None):
    """Forward pass of GatedUpConv2d (training-mode BatchNorm). NCHW f32 in/out."""
    wf, bf_, wg, bg_, gamma, beta = (params["wf"], params["bf"], params["wg"],
                                     params["bg"], params["gamma"], params["beta"])
    N, C_in, H, W = x_nchw.shape
    C_out, _, kh, kw = wf.shape
    assert scale_factor == 2 and kh == kw and kh == 2 * padding + 1, (
        "sub-pixel fold implemented for scale_factor=2, square kernel, 'same' padding")

    k, p = kh, padding
    lo = (0 - p) // 2                      # min original-row offset over sub-pixels
    hi = (1 + (k - 1) - p) // 2            # max original-row offset
    kk = hi - lo + 1                       # unified window size at original resolution
    pad_b, pad_a = -lo, hi                 # zero pad before/after (rows and cols)

    Ho, Wo = 2 * H, 2 * W
    K = kk * kk * C_in
    P = _round_up(4 * C_out, LANE)         # 4 sub-pixels x C_out, padded to lanes

    # ---- fold upsample into 4 sub-pixel weight sets; fuse [features | gates] ------
    def fold(w):
        wsub = jnp.zeros((2, 2, kk, kk, C_in, C_out), jnp.float32)
        for a in range(2):
            for b in range(2):
                for th in range(k):
                    for tw in range(k):
                        ih = (a + th - p) // 2 - lo
                        iw = (b + tw - p) // 2 - lo
                        wsub = wsub.at[a, b, ih, iw].add(
                            w[:, :, th, tw].astype(jnp.float32).T)   # (C_in, C_out)
        m = jnp.transpose(wsub, (2, 3, 4, 0, 1, 5)).reshape(K, 4 * C_out)
        return jnp.pad(m, ((0, 0), (0, P - 4 * C_out)))

    w_all = jnp.concatenate([fold(wf), fold(wg)], axis=1).astype(jnp.bfloat16)

    def pad_bias(b):
        return jnp.pad(jnp.tile(b.astype(jnp.float32), 4), (0, P - 4 * C_out))

    b_all = jnp.concatenate([pad_bias(bf_), pad_bias(bg_)]).reshape(1, 2 * P)

    # ---- glue: NHWC bf16 + zero pad + (kk x kk) im2col at ORIGINAL resolution ------
    x_nhwc = jnp.transpose(x_nchw, (0, 2, 3, 1)).astype(jnp.bfloat16)
    x_pp = jnp.pad(x_nhwc, ((0, 0), (pad_b, pad_a), (pad_b, pad_a), (0, 0)))
    cols = [x_pp[:, ih:ih + H, iw:iw + W, :] for ih in range(kk) for iw in range(kk)]
    x_im = jnp.concatenate(cols, axis=-1)                      # (N, H, W, K)
    M_total = N * H * W
    x_flat = x_im.reshape(M_total, K)

    # ---- tiling: flat M axis, lane-dense blocks, VMEM-budgeted tile size ----------
    vmem_limit = _vmem_limit_bytes()
    if tile_m is None:
        k_lanes = _round_up(K, LANE)
        per_row = (2 * 2 * k_lanes          # x block, bf16, double-buffered
                   + 2 * 2 * P              # y block, bf16, double-buffered
                   + 4 * 4 * 2 * P)         # f32 acc + epilogue temps (rough)
        tile_m = (vmem_limit // 2) // per_row
        tile_m = max(256, min(8192, (tile_m // 256) * 256))
    tile_m = max(256, _round_up(min(tile_m, _round_up(M_total, 256)), 256))
    M_pad = _round_up(M_total, tile_m)
    MT = M_pad // tile_m
    if M_pad > M_total:
        x_flat = jnp.pad(x_flat, ((0, M_pad - M_total), (0, 0)))

    kernel = functools.partial(gated_conv_kernel, p_lanes=P, neg_slope=neg_slope)

    cost = pl.CostEstimate(
        flops=2 * M_pad * K * 2 * P,
        transcendentals=M_pad * P,
        bytes_accessed=(M_pad * K * 2 + K * 2 * P * 2 + 2 * P * 4
                        + M_pad * P * 2 + 2 * MT * P * 4))

    y_flat, psum, psq = pl.pallas_call(
        kernel,
        out_shape=(
            jax.ShapeDtypeStruct((M_pad, P), jnp.bfloat16),
            jax.ShapeDtypeStruct((MT, 1, P), jnp.float32),
            jax.ShapeDtypeStruct((MT, 1, P), jnp.float32),
        ),
        grid_spec=pltpu.PrefetchScalarGridSpec(
            num_scalar_prefetch=0,
            grid=(MT,),
            in_specs=[
                pl.BlockSpec((tile_m, K), lambda t: (t, 0)),
                pl.BlockSpec((K, 2 * P), lambda t: (0, 0)),
                pl.BlockSpec((1, 2 * P), lambda t: (0, 0)),
            ],
            out_specs=[
                pl.BlockSpec((tile_m, P), lambda t: (t, 0)),
                pl.BlockSpec((None, 1, P), lambda t: (t, 0, 0)),
                pl.BlockSpec((None, 1, P), lambda t: (t, 0, 0)),
            ],
        ),
        compiler_params=pltpu.CompilerParams(
            dimension_semantics=("parallel",),
            vmem_limit_bytes=vmem_limit),
        cost_estimate=cost,
    )(x_flat, w_all, b_all)

    # ---- glue: finish BatchNorm (training mode, biased variance) -------------------
    col_sum = jnp.sum(psum[:, 0, :], axis=0)                   # (P,)
    col_sq = jnp.sum(psq[:, 0, :], axis=0)
    ch_sum = col_sum[:4 * C_out].reshape(4, C_out).sum(axis=0)
    ch_sq = col_sq[:4 * C_out].reshape(4, C_out).sum(axis=0)

    n_pad = M_pad - M_total
    if n_pad > 0:
        # Each zero-padded M row contributes the constant leaky(bf)*sigmoid(bg)
        # to every one of the 4 sub-pixel columns of each channel.
        y0 = jnp.where(bf_ >= 0, bf_, neg_slope * bf_) * jax.nn.sigmoid(bg_)
        y0 = y0.astype(jnp.bfloat16).astype(jnp.float32)
        ch_sum = ch_sum - 4.0 * n_pad * y0
        ch_sq = ch_sq - 4.0 * n_pad * y0 * y0

    M_out = N * Ho * Wo
    mean = ch_sum / M_out
    var = jnp.maximum(ch_sq / M_out - mean * mean, 0.0)
    invstd = lax.rsqrt(var + eps)
    scale = gamma * invstd
    shift = beta - mean * scale

    # ---- glue: sub-pixel de-interleave + affine + NHWC->NCHW (XLA-fused) -----------
    y = y_flat[:M_total, :4 * C_out].reshape(N, H, W, 2, 2, C_out)
    y = jnp.transpose(y, (0, 1, 3, 2, 4, 5)).reshape(N, Ho, Wo, C_out)
    out = (y.astype(jnp.float32) * scale.reshape(1, 1, 1, C_out)
           + shift.reshape(1, 1, 1, C_out))
    return jnp.transpose(out, (0, 3, 1, 2))


# ----------------------------------------------------------------------------
# Pure-JAX reference (f32 everywhere) for the correctness check.
# ----------------------------------------------------------------------------
def reference(x_nchw, params, *, scale_factor=2, padding=1, neg_slope=0.2, eps=1e-5):
    x_up = jnp.repeat(jnp.repeat(x_nchw, scale_factor, axis=2),
                      scale_factor, axis=3)

    def conv(xx, w, b):
        yc = lax.conv_general_dilated(
            xx, w, window_strides=(1, 1),
            padding=[(padding, padding), (padding, padding)],
            dimension_numbers=("NCHW", "OIHW", "NCHW"),
            preferred_element_type=jnp.float32)
        return yc + b.reshape(1, -1, 1, 1)

    gating = conv(x_up, params["wg"], params["bg"])
    feature = conv(x_up, params["wf"], params["bf"])
    act = jnp.where(feature >= 0, feature, neg_slope * feature)
    y = act * jax.nn.sigmoid(gating)

    mean = jnp.mean(y, axis=(0, 2, 3), keepdims=True)
    var = jnp.mean((y - mean) ** 2, axis=(0, 2, 3), keepdims=True)   # biased
    yn = (y - mean) * lax.rsqrt(var + eps)
    return (yn * params["gamma"].reshape(1, -1, 1, 1)
            + params["beta"].reshape(1, -1, 1, 1))


if __name__ == "__main__":
    key = jax.random.PRNGKey(0)
    k_x, k_wf, k_bf, k_wg, k_bg = jax.random.split(key, 5)

    N, C_in, H, W = 2, 4, 16, 16
    C_out, ksize = 8, 3

    x = jax.random.normal(k_x, (N, C_in, H, W), dtype=jnp.float32)
    params = {
        "wf": 0.1 * jax.random.normal(k_wf, (C_out, C_in, ksize, ksize), jnp.float32),
        "bf": 0.1 * jax.random.normal(k_bf, (C_out,), jnp.float32),
        "wg": 0.1 * jax.random.normal(k_wg, (C_out, C_in, ksize, ksize), jnp.float32),
        "bg": 0.1 * jax.random.normal(k_bg, (C_out,), jnp.float32),
        "gamma": jnp.ones((C_out,), jnp.float32),   # BatchNorm2d affine init
        "beta": jnp.zeros((C_out,), jnp.float32),
    }

    out = jax.jit(gated_up_conv2d)(x, params)
    out = jax.block_until_ready(out)
    assert out.shape == (N, C_out, 2 * H, 2 * W), out.shape

    # Semantics check vs. full-f32 reference (tolerance covers bf16 MXU inputs and
    # the folded sub-pixel weights).
    ref = reference(x, params)
    err = float(jnp.max(jnp.abs(out - ref)))
    assert jnp.allclose(out, ref, rtol=5e-2, atol=5e-2), err

    print("KERNEL_OK")
</pallas_src>

<mosaic_0001>
module attributes {stable_mosaic.version = 11 : i64} {
  func.func @gated_conv_kernel(%arg0: i32, %arg1: memref<512x36xbf16, #tpu.memory_space<vmem>>, %arg2: memref<36x256xbf16, #tpu.memory_space<vmem>>, %arg3: memref<1x256xf32, #tpu.memory_space<vmem>>, %arg4: memref<512x128xbf16, #tpu.memory_space<vmem>>, %arg5: memref<1x1x128xf32, #tpu.memory_space<vmem>>, %arg6: memref<1x1x128xf32, #tpu.memory_space<vmem>>) attributes {dimension_semantics = [#tpu.dimension_semantics<parallel>], iteration_bounds = array<i64: 1>, scalar_prefetch = 0 : i64, scratch_operands = 0 : i64, tpu.core_type = #tpu.core_type<tc>, window_params = [{transform_indices = @transform_0, window_bounds = array<i64: 512, 36>}, {pipeline_mode = #tpu.pipeline_mode<synchronous>, transform_indices = @transform_1, window_bounds = array<i64: 36, 256>}, {pipeline_mode = #tpu.pipeline_mode<synchronous>, transform_indices = @transform_2, window_bounds = array<i64: 1, 256>}, {transform_indices = @transform_3, window_bounds = array<i64: 512, 128>}, {transform_indices = @transform_4, window_bounds = array<i64: 1, 1, 128>}, {transform_indices = @transform_5, window_bounds = array<i64: 1, 1, 128>}]} {
    %c0 = arith.constant 0 : index
    %c0_0 = arith.constant 0 : index
    %0 = vector.load %arg1[%c0, %c0_0] : memref<512x36xbf16, #tpu.memory_space<vmem>>, vector<512x36xbf16>
    %c0_1 = arith.constant 0 : index
    %c0_2 = arith.constant 0 : index
    %1 = vector.load %arg2[%c0_1, %c0_2] : memref<36x256xbf16, #tpu.memory_space<vmem>>, vector<36x256xbf16>
    %cst = arith.constant dense<0.000000e+00> : vector<512x256xf32>
    %2 = tpu.matmul %0, %1, %cst {dimension_numbers = #tpu.dot_dimension_numbers<[1], [0], [0], [1], [0, 0, 1, 1], [], []>} : vector<512x36xbf16>, vector<36x256xbf16>, vector<512x256xf32> -> vector<512x256xf32>
    %c0_3 = arith.constant 0 : index
    %c0_4 = arith.constant 0 : index
    %3 = vector.load %arg3[%c0_3, %c0_4] : memref<1x256xf32, #tpu.memory_space<vmem>>, vector<1x256xf32>
    %4 = vector.broadcast %3 : vector<1x256xf32> to vector<512x256xf32>
    %5 = arith.addf %2, %4 : vector<512x256xf32>
    %6 = vector.extract_strided_slice %5 {offsets = [0, 0], sizes = [512, 128], strides = [1, 1]} : vector<512x256xf32> to vector<512x128xf32>
    %7 = vector.extract_strided_slice %5 {offsets = [0, 128], sizes = [512, 128], strides = [1, 1]} : vector<512x256xf32> to vector<512x128xf32>
    %cst_5 = arith.constant 0.000000e+00 : f32
    %8 = vector.broadcast %cst_5 : f32 to vector<512x128xf32>
    %9 = arith.cmpf oge, %6, %8 : vector<512x128xf32>
    %cst_6 = arith.constant 2.000000e-01 : f32
    %10 = vector.broadcast %cst_6 : f32 to vector<512x128xf32>
    %11 = arith.mulf %10, %6 : vector<512x128xf32>
    %12 = arith.select %9, %6, %11 : vector<512x128xi1>, vector<512x128xf32>
    %13 = arith.negf %7 : vector<512x128xf32>
    %14 = math.exp %13 : vector<512x128xf32>
    %cst_7 = arith.constant 1.000000e+00 : f32
    %15 = vector.broadcast %cst_7 : f32 to vector<512x128xf32>
    %16 = arith.addf %15, %14 : vector<512x128xf32>
    %17 = arith.divf %15, %16 : vector<512x128xf32>
    %18 = arith.mulf %12, %17 : vector<512x128xf32>
    %19 = arith.truncf %18 : vector<512x128xf32> to vector<512x128xbf16>
    %c0_8 = arith.constant 0 : index
    %c0_9 = arith.constant 0 : index
    %20 = vector.load %arg4[%c0_8, %c0_9] : memref<512x128xbf16, #tpu.memory_space<vmem>>, vector<512x128xbf16>
    tpu.vector_store %arg4[%c0_8, %c0_9], %19 {strides = array<i32>} : memref<512x128xbf16, #tpu.memory_space<vmem>>, vector<512x128xbf16>,
    %21 = arith.extf %19 : vector<512x128xbf16> to vector<512x128xf32>
    %cst_10 = arith.constant dense<0.000000e+00> : vector<128xf32>
    %22 = vector.multi_reduction <add>, %21, %cst_10 [0] : vector<512x128xf32> to vector<128xf32>
    %23 = vector.shape_cast %22 : vector<128xf32> to vector<1x128xf32>
    %c0_11 = arith.constant 0 : index
    %c0_12 = arith.constant 0 : index
    %c0_13 = arith.constant 0 : index
    %24 = vector.load %arg5[%c0_11, %c0_12, %c0_13] : memref<1x1x128xf32, #tpu.memory_space<vmem>>, vector<1x1x128xf32>
    %25 = vector.shape_cast %24 : vector<1x1x128xf32> to vector<1x128xf32>
    %26 = vector.shape_cast %23 : vector<1x128xf32> to vector<1x1x128xf32>
    tpu.vector_store %arg5[%c0_11, %c0_12, %c0_13], %26 {strides = array<i32>} : memref<1x1x128xf32, #tpu.memory_space<vmem>>, vector<1x1x128xf32>,
    %27 = arith.mulf %21, %21 : vector<512x128xf32>
    %cst_14 = arith.constant dense<0.000000e+00> : vector<128xf32>
    %28 = vector.multi_reduction <add>, %27, %cst_14 [0] : vector<512x128xf32> to vector<128xf32>
    %29 = vector.shape_cast %28 : vector<128xf32> to vector<1x128xf32>
    %c0_15 = arith.constant 0 : index
    %c0_16 = arith.constant 0 : index
    %c0_17 = arith.constant 0 : index
    %30 = vector.load %arg6[%c0_15, %c0_16, %c0_17] : memref<1x1x128xf32, #tpu.memory_space<vmem>>, vector<1x1x128xf32>
    %31 = vector.shape_cast %30 : vector<1x1x128xf32> to vector<1x128xf32>
    %32 = vector.shape_cast %29 : vector<1x128xf32> to vector<1x1x128xf32>
    tpu.vector_store %arg6[%c0_15, %c0_16, %c0_17], %32 {strides = array<i32>} : memref<1x1x128xf32, #tpu.memory_space<vmem>>, vector<1x1x128xf32>,
    return
  }
  func.func @transform_0(%arg0: i32) -> (i32, i32) {
    %c0_i32 = arith.constant 0 : i32
    %c0_i32_0 = arith.constant 0 : i32
    return %arg0, %c0_i32 : i32, i32
  }
  func.func @transform_1(%arg0: i32) -> (i32, i32) {
    %c0_i32 = arith.constant 0 : i32
    %c0_i32_0 = arith.constant 0 : i32
    %c0_i32_1 = arith.constant 0 : i32
    return %c0_i32, %c0_i32_0 : i32, i32
  }
  func.func @transform_2(%arg0: i32) -> (i32, i32) {
    %c0_i32 = arith.constant 0 : i32
    %c0_i32_0 = arith.constant 0 : i32
    %c0_i32_1 = arith.constant 0 : i32
    return %c0_i32, %c0_i32_0 : i32, i32
  }
  func.func @transform_3(%arg0: i32) -> (i32, i32) {
    %c0_i32 = arith.constant 0 : i32
    %c0_i32_0 = arith.constant 0 : i32
    return %arg0, %c0_i32 : i32, i32
  }
  func.func @transform_4(%arg0: i32) -> (i32, i32, i32) {
    %c0_i32 = arith.constant 0 : i32
    %c0_i32_0 = arith.constant 0 : i32
    %c0_i32_1 = arith.constant 0 : i32
    return %arg0, %c0_i32, %c0_i32_0 : i32, i32, i32
  }
  func.func @transform_5(%arg0: i32) -> (i32, i32, i32) {
    %c0_i32 = arith.constant 0 : i32
    %c0_i32_0 = arith.constant 0 : i32
    %c0_i32_1 = arith.constant 0 : i32
    return %arg0, %c0_i32, %c0_i32_0 : i32, i32, i32
  }
}

</mosaic_0001>

<bundles_post_ra>
// kernel: tile.13
= control target key start
LH: loop header
LB: loop body
LE: loop exit
PB: predicated region body
PF: predicated region fallthrough
CT: control target
= control target key end

     0   :  { %2 = vsyncpa [#allocation1], 0  ;;  %s44_s6 = smov [#allocation0]   ;;  %s70_s0 = inlined_call_operand.hbm [shape: f32[8], index: 0, kind: input, shape index: {}]   ;;  %s71_s1 = inlined_call_operand.vmem [shape: f32[4,8], index: 1, kind: output, shape index: {}]  }
   0x1   :  { %s9_s7 = sshll.u32 %s44_s6, 4  ;;  %s20_s10 = scalar_lea.hbm %s70_s0, 16  ;;  %s10_s7 = int_to_ptr.vmem [resolvable:$true] %s9_s7 }
   0x2   :  { %p21_p0 = scmp.ne.s32.totalorder %s70_s0, %s20_s10  ;;  %p24_p1 = scmp.lt.u32.totalorder %s20_s10, %s70_s0 }
   0x4   :  { %p26_p2 = pnand %p24_p1, %p21_p0 }
   0x6   :  { %29 = shalt.err (!%p26_p2)
}
   0x7   :  { %s30_s15 = scalar_lea.vmem %s10_s7, 16  ;;  %s34_s16 = scalar_lea.vmem %s10_s7, 32 }
   0x8   :  { %p31_p3 = scmp.ne.s32.totalorder %s10_s7, %s30_s15  ;;  %p35_p4 = scmp.lt.s32.totalorder %s10_s7, %s10_s7 }
   0x9   :  { %p36_p5 = scmp.lt.s32.totalorder %s34_s16, %s30_s15 }
   0xb   :  { %p37_p6 = por %p36_p5, %p35_p4 }
   0xd   :  { %p38_p7 = pnand %p37_p6, %p31_p3 }
   0xf   :  { %41 = shalt.err (!%p38_p7)
}
  0x10   :  { %12 = dma.hbm_to_vmem [thread:$0]  %s70_s0, 16, %s10_s7, [#allocation1]  }
  0x11   :  { %42 = dma.done.wait [#allocation1], 16  }
  0x12   :  { %43 = vsyncadd [#allocation1], 4294967280  ;;  %v16_v0 = vld [vmem:[#allocation0] ss:$0 sm:$0xff] }
  0x13   :  { %17 = vst [vmem:[%s71_s1] sm:$0xf] %v16_v0 }
  0x14   :  { %18 = vsyncpa [#allocation1], 1 }

// kernel: tile.14
= control target key start
LH: loop header
LB: loop body
LE: loop exit
PB: predicated region body
PF: predicated region fallthrough
CT: control target
= control target key end

     0   :  { %vm7_vm0 = vcmask 64512   ;;  %s37_s8 = smov 8   ;;  %s38_s9 = smov 16   ;;  %vm13_vm1 = vcmask 261312   ;;  %vm19_vm2 = vcmask 195712   ;;  %vm25_vm3 = vcmask 130112   ;;  %s55_s0 = inlined_call_operand.vmem [shape: f32[4,8], index: 0, kind: input, shape index: {}]   ;;  %s56_s1 = inlined_call_operand.vmem [shape: f32[32], index: 1, kind: output, shape index: {}]  }
   0x1   :  { %v4_v0 = vld [vmem:[%s55_s0] sm:$0xf]  ;;  %s36_s0 = smov 24  }
   0x2   :  { %5 = vst [vmem:[#allocation1] sm:$0xf] %v4_v0 }
   0x9   :  { %v10_v1 = vld [vmem:[#allocation1 + $0x3] sm:$0x1]   ;;  %v22_v2 = vld [vmem:[#allocation1 + $0x1] sm:$0x1]   ;;  %v6_v3 = vld [vmem:[#allocation1] sm:$0x1]  }
   0xa   :  { %11 = vrot.lane.b32.xlu0 %v10_v1, %s36_s0  ;;  %23 = vrot.lane.b32.xlu1 %v22_v2, %s37_s8  ;;  %v16_v4 = vld [vmem:[#allocation1 + $0x2] sm:$0x1]   ;;  %8 = vst.msk [vmem:[#allocation0] sm:$0x1] %vm7_vm0, %v6_v3  }
   0xe   :  { %17 = vrot.lane.b32.xlu0 %v16_v4, %s38_s9 }
  0x7c   :  { %v12_v5 = vpop.permute.xlu0 %11   ;;  %v24_v6 = vpop.permute.xlu1 %23  }
  0x7d   :  { %14 = vst.msk [vmem:[#allocation0] sm:$0x1] %vm13_vm1, %v12_v5  }
  0x80   :  { %v18_v7 = vpop.permute.xlu0 %17  }
  0x81   :  { %20 = vst.msk [vmem:[#allocation0] sm:$0x1] %vm19_vm2, %v18_v7  }
  0x82   :  { %26 = vst.msk [vmem:[#allocation0] sm:$0x1] %vm25_vm3, %v24_v6  }
  0x89   :  { %v30_v8 = vld [vmem:[#allocation0] sm:$0x1] }
  0x8a   :  { %32 = vst [vmem:[%s56_s1] sm:$0x1] %v30_v8 }

// kernel: gated_up_conv2d.1
= control target key start
LH: loop header
LB: loop body
LE: loop exit
PB: predicated region body
PF: predicated region fallthrough
CT: control target
= control target key end

     0   :  { %v2742_v1 = vmov 0   ;;  %vm381_vm0 = vcmask 1041408   ;;  %vm284_vm1 = vcmask 293888   ;;  %v89_v41 = vlaneseq  ;;  %s3698_s1 = inlined_call_operand.vmem [shape: bf16[36,256], index: 1, kind: input, shape index: {}]   ;;  %s3699_s0 = inlined_call_operand.vmem [shape: bf16[512,36], index: 0, kind: input, shape index: {}]   ;;  %s3700_s2 = inlined_call_operand.vmem [shape: f32[1,256], index: 2, kind: input, shape index: {}]   ;;  %s3701_s3 = inlined_call_operand.vmem [shape: bf16[512,128], index: 3, kind: output, shape index: {0}]   ;;  %s3702_s4 = inlined_call_operand.vmem [shape: f32[1,1,128], index: 4, kind: output, shape index: {1}]   ;;  %s3703_s5 = inlined_call_operand.vmem [shape: f32[1,1,128], index: 5, kind: output, shape index: {2}]  }
   0x1   :  { %v2442_v0 = vld [vmem:[%s3698_s1 + $0x4] ss:$8 sps:$4 sm:$0xff]   ;;  %420 = vmatprep.mubr.bf16.mxu0 %v2742_v1  ;;  %580 = vmatprep.mubr.bf16.mxu1 %v2742_v1  ;;  %v2444_v2 = vld [vmem:[%s3698_s1] ss:$8 sps:$4 sm:$0xff]   ;;  %v2445_v3 = vld [vmem:[%s3698_s1 + $0x14] ss:$8 sps:$4 sm:$0xff]  }
   0x2   :  { %388 = vmatprep.subr.bf16.mxu0 %v2442_v0  ;;  %v86_v4 = vld [vmem:[%s3698_s1 + $0x20] sm:$0x33]  ;;  %2435 = vmatprep.subr.bf16.mxu1 %v2442_v0  ;;  %v2447_v5 = vld [vmem:[%s3698_s1 + $0x10] ss:$8 sps:$4 sm:$0xff]   ;;  %v2451_v11 = vld [vmem:[%s3699_s0 + $0x8] sm:$0xff]   ;;  %v90_v42 = vshrl.u32 %v89_v41, 7 }
   0x3   :  { %389 = vmatpush1.bf16.msra.mxu0 %v2444_v2  ;;  %2438 = vmatpush1.bf16.msra.mxu1 %v2444_v2  ;;  %v2018_v6 = vcombine.high %v86_v4, %v86_v4  ;;  %v2017_v7 = vcombine.low %v86_v4, %v86_v4  ;;  %v2450_v9 = vld [vmem:[%s3699_s0] sm:$0xff]   ;;  %v2457_v12 = vld [vmem:[%s3699_s0 + $0x88] sm:$0xff]   ;;  %v2452_v13 = vld [vmem:[%s3699_s0 + $0x10] sm:$0xff]  }
   0x4   :  { %390 = vmatprep.subr.bf16.mxu0 %v2445_v3  ;;  %2436 = vmatprep.subr.bf16.mxu1 %v2445_v3  ;;  %v2455_v10 = vld [vmem:[%s3699_s0 + $0x80] sm:$0xff]   ;;  %v2459_v14 = vld [vmem:[%s3699_s0 + $0x90] sm:$0xff]   ;;  %v2453_v15 = vld [vmem:[%s3699_s0 + $0x18] sm:$0xff]   ;;  %v95_v43 = vsub.s32 1, %v90_v42  ;;  %v91_v59 = vsub.s32 0, %v90_v42 }
   0x5   :  { %v383_v8 = vsel %vm381_vm0, %v2017_v7, 0  ;;  %v2461_v16 = vld [vmem:[%s3699_s0 + $0x98] sm:$0xff]   ;;  %v2454_v17 = vld [vmem:[%s3699_s0 + $0x20] sm:$0xff]   ;;  %v2456_v19 = vld [vmem:[%s3699_s0 + $0x28] sm:$0xff]  }
   0x6   :  { %v2463_v18 = vld [vmem:[%s3699_s0 + $0xa0] sm:$0xff]   ;;  %v2465_v20 = vld [vmem:[%s3699_s0 + $0xa8] sm:$0xff]   ;;  %v2458_v21 = vld [vmem:[%s3699_s0 + $0x30] sm:$0xff]  }
   0x7   :  { %391 = vmatpush1.bf16.msra.mxu0 %v2447_v5  ;;  %2439 = vmatpush1.bf16.msra.mxu1 %v2447_v5  ;;  %v2467_v22 = vld [vmem:[%s3699_s0 + $0xb0] sm:$0xff]   ;;  %v2460_v23 = vld [vmem:[%s3699_s0 + $0x38] sm:$0xff]   ;;  %v2462_v25 = vld [vmem:[%s3699_s0 + $0x40] sm:$0xff]  }
   0x8   :  { %2019 = vmatprep.subr.msk.bf16.mxu0 %vm381_vm0, %v2018_v6  ;;  %2437 = vmatprep.subr.msk.bf16.mxu1 %vm381_vm0, %v2018_v6  ;;  %v2469_v24 = vld [vmem:[%s3699_s0 + $0xb8] sm:$0xff]   ;;  %v2471_v26 = vld [vmem:[%s3699_s0 + $0xc0] sm:$0xff]   ;;  %v2464_v27 = vld [vmem:[%s3699_s0 + $0x48] sm:$0xff]  }
   0x9   :  { %v2473_v28 = vld [vmem:[%s3699_s0 + $0xc8] sm:$0xff]   ;;  %v2466_v29 = vld [vmem:[%s3699_s0 + $0x50] sm:$0xff]   ;;  %v2468_v31 = vld [vmem:[%s3699_s0 + $0x58] sm:$0xff]  }
   0xa   :  { %v2475_v30 = vld [vmem:[%s3699_s0 + $0xd0] sm:$0xff]   ;;  %v2477_v32 = vld [vmem:[%s3699_s0 + $0xd8] sm:$0xff]   ;;  %v2470_v33 = vld [vmem:[%s3699_s0 + $0x60] sm:$0xff]  }
   0xb   :  { %393 = vmatpush1.bf16.msra.mxu0 %v383_v8  ;;  %2440 = vmatpush1.bf16.msra.mxu1 %v383_v8  ;;  %v2478_v34 = vld [vmem:[%s3699_s0 + $0xe0] sm:$0xff]   ;;  %v2472_v35 = vld [vmem:[%s3699_s0 + $0x68] sm:$0xff]   ;;  %v2474_v37 = vld [vmem:[%s3699_s0 + $0x70] sm:$0xff]  }
   0xc   :  { %v2479_v36 = vld [vmem:[%s3699_s0 + $0xe8] sm:$0xff]   ;;  %v2480_v38 = vld [vmem:[%s3699_s0 + $0xf0] sm:$0xff]   ;;  %v2476_v39 = vld [vmem:[%s3699_s0 + $0x78] sm:$0xff]  }
   0xd   :  { %v2481_v40 = vld [vmem:[%s3699_s0 + $0xf8] sm:$0xff]   ;;  %v87_v44 = vld [vmem:[%s3700_s2] sm:$0x3] }
   0xe   :  { %2020 = vmatmul.mubr.msk.bf16.vlgmr.msra.gmra.mrb[0].mxu0 %vm284_vm1, %v2450_v9  ;;  %2036 = vmatmul.mubr.msk.bf16.vlgmr.msra.gmra.mrb[0].mxu1 %vm284_vm1, %v2455_v10  ;;  %v2951_v45 = vrot.slane %v87_v44, %v95_v43  ;;  %v2957_v3 = vrot.slane %v87_v44, %v91_v59 }
   0xf   :  { %430 = vmatprep.mubr.bf16.mxu0 %v2742_v1  ;;  %590 = vmatprep.mubr.bf16.mxu1 %v2742_v1 }
  0x16   :  { %2021 = vmatmul.mubr.msk.bf16.gmra.mrb[4].mxu0 %vm284_vm1, %v2451_v11  ;;  %2037 = vmatmul.mubr.msk.bf16.gmra.mrb[4].mxu1 %vm284_vm1, %v2457_v12 }
  0x17   :  { %440 = vmatprep.mubr.bf16.mxu0 %v2742_v1  ;;  %600 = vmatprep.mubr.bf16.mxu1 %v2742_v1 }
  0x1e   :  { %2022 = vmatmul.mubr.msk.bf16.gmra.mrb[8].mxu0 %vm284_vm1, %v2452_v13  ;;  %2038 = vmatmul.mubr.msk.bf16.gmra.mrb[8].mxu1 %vm284_vm1, %v2459_v14 }
  0x1f   :  { %450 = vmatprep.mubr.bf16.mxu0 %v2742_v1  ;;  %610 = vmatprep.mubr.bf16.mxu1 %v2742_v1 }
  0x26   :  { %2023 = vmatmul.mubr.msk.bf16.gmra.mrb[12].mxu0 %vm284_vm1, %v2453_v15  ;;  %2039 = vmatmul.mubr.msk.bf16.gmra.mrb[12].mxu1 %vm284_vm1, %v2461_v16 }
  0x27   :  { %460 = vmatprep.mubr.bf16.mxu0 %v2742_v1  ;;  %620 = vmatprep.mubr.bf16.mxu1 %v2742_v1 }
  0x2e   :  { %2024 = vmatmul.mubr.msk.bf16.gmra.mrb[16].mxu0 %vm284_vm1, %v2454_v17  ;;  %2040 = vmatmul.mubr.msk.bf16.gmra.mrb[16].mxu1 %vm284_vm1, %v2463_v18 }
  0x2f   :  { %470 = vmatprep.mubr.bf16.mxu0 %v2742_v1  ;;  %630 = vmatprep.mubr.bf16.mxu1 %v2742_v1 }
  0x36   :  { %2025 = vmatmul.mubr.msk.bf16.gmra.mrb[20].mxu0 %vm284_vm1, %v2456_v19  ;;  %2041 = vmatmul.mubr.msk.bf16.gmra.mrb[20].mxu1 %vm284_vm1, %v2465_v20 }
  0x37   :  { %480 = vmatprep.mubr.bf16.mxu0 %v2742_v1  ;;  %640 = vmatprep.mubr.bf16.mxu1 %v2742_v1 }
  0x3e   :  { %2026 = vmatmul.mubr.msk.bf16.gmra.mrb[24].mxu0 %vm284_vm1, %v2458_v21  ;;  %2042 = vmatmul.mubr.msk.bf16.gmra.mrb[24].mxu1 %vm284_vm1, %v2467_v22 }
  0x3f   :  { %490 = vmatprep.mubr.bf16.mxu0 %v2742_v1  ;;  %650 = vmatprep.mubr.bf16.mxu1 %v2742_v1 }
  0x46   :  { %2027 = vmatmul.mubr.msk.bf16.gmra.mrb[28].mxu0 %vm284_vm1, %v2460_v23  ;;  %2043 = vmatmul.mubr.msk.bf16.gmra.mrb[28].mxu1 %vm284_vm1, %v2469_v24 }
  0x47   :  { %500 = vmatprep.mubr.bf16.mxu0 %v2742_v1  ;;  %660 = vmatprep.mubr.bf16.mxu1 %v2742_v1 }
  0x4e   :  { %2028 = vmatmul.mubr.msk.bf16.gmra.mrb[32].mxu0 %vm284_vm1, %v2462_v25  ;;  %2044 = vmatmul.mubr.msk.bf16.gmra.mrb[32].mxu1 %vm284_vm1, %v2471_v26 }
  0x4f   :  { %510 = vmatprep.mubr.bf16.mxu0 %v2742_v1  ;;  %670 = vmatprep.mubr.bf16.mxu1 %v2742_v1 }
  0x56   :  { %2029 = vmatmul.mubr.msk.bf16.gmra.mrb[36].mxu0 %vm284_vm1, %v2464_v27  ;;  %2045 = vmatmul.mubr.msk.bf16.gmra.mrb[36].mxu1 %vm284_vm1, %v2473_v28 }
  0x57   :  { %520 = vmatprep.mubr.bf16.mxu0 %v2742_v1  ;;  %680 = vmatprep.mubr.bf16.mxu1 %v2742_v1 }
  0x5e   :  { %2030 = vmatmul.mubr.msk.bf16.gmra.mrb[40].mxu0 %vm284_vm1, %v2466_v29  ;;  %2046 = vmatmul.mubr.msk.bf16.gmra.mrb[40].mxu1 %vm284_vm1, %v2475_v30 }
  0x5f   :  { %530 = vmatprep.mubr.bf16.mxu0 %v2742_v1  ;;  %690 = vmatprep.mubr.bf16.mxu1 %v2742_v1 }
  0x66   :  { %2031 = vmatmul.mubr.msk.bf16.gmra.mrb[44].mxu0 %vm284_vm1, %v2468_v31  ;;  %2047 = vmatmul.mubr.msk.bf16.gmra.mrb[44].mxu1 %vm284_vm1, %v2477_v32 }
  0x67   :  { %540 = vmatprep.mubr.bf16.mxu0 %v2742_v1  ;;  %700 = vmatprep.mubr.bf16.mxu1 %v2742_v1 }
  0x6e   :  { %2032 = vmatmul.mubr.msk.bf16.gmra.mrb[48].mxu0 %vm284_vm1, %v2470_v33  ;;  %2048 = vmatmul.mubr.msk.bf16.gmra.mrb[48].mxu1 %vm284_vm1, %v2478_v34 }
  0x6f   :  { %550 = vmatprep.mubr.bf16.mxu0 %v2742_v1  ;;  %710 = vmatprep.mubr.bf16.mxu1 %v2742_v1 }
  0x76   :  { %2033 = vmatmul.mubr.msk.bf16.gmra.mrb[52].mxu0 %vm284_vm1, %v2472_v35  ;;  %2049 = vmatmul.mubr.msk.bf16.gmra.mrb[52].mxu1 %vm284_vm1, %v2479_v36 }
  0x77   :  { %560 = vmatprep.mubr.bf16.mxu0 %v2742_v1  ;;  %720 = vmatprep.mubr.bf16.mxu1 %v2742_v1 }
  0x7e   :  { %2034 = vmatmul.mubr.msk.bf16.gmra.mrb[56].mxu0 %vm284_vm1, %v2474_v37  ;;  %2050 = vmatmul.mubr.msk.bf16.gmra.mrb[56].mxu1 %vm284_vm1, %v2480_v38 }
  0x7f   :  { %570 = vmatprep.mubr.bf16.mxu0 %v2742_v1  ;;  %730 = vmatprep.mubr.bf16.mxu1 %v2742_v1 }
  0x86   :  { %2035 = vmatmul.mubr.msk.bf16.gmra.mrb[60].mxu0 %vm284_vm1, %v2476_v39  ;;  %2051 = vmatmul.mubr.msk.bf16.gmra.mrb[60].mxu1 %vm284_vm1, %v2481_v40 }
  0xe1   :  { %v422_v46 = vpop.f32.mrb[0].mxu0  ;;  %v582_v47 = vpop.f32.mrb[0].mxu1 }
  0xe2   :  { %v424_v48 = vpop.f32.mrb[1].mxu0  ;;  %v584_v49 = vpop.f32.mrb[1].mxu1  ;;  %v423_v13 = vadd.f32 %v422_v46, %v2957_v3  ;;  %v583_v23 = vadd.f32 %v582_v47, %v2957_v3 }
  0xe3   :  { %v425_v50 = vadd.f32 %v424_v48, %v2951_v45  ;;  %v426_v51 = vpop.f32.mrb[2].mxu0  ;;  %v585_v52 = vadd.f32 %v584_v49, %v2951_v45  ;;  %v586_v53 = vpop.f32.mrb[2].mxu1 }
  0xe4   :  { %v428_v54 = vpop.f32.mrb[3].mxu0  ;;  %v588_v55 = vpop.f32.mrb[3].mxu1  ;;  %vm741_vm2 = vcmp.ge.f32.partialorder %v423_v13, 0.0  ;;  %v805_v30 = vmul.f32 0.2, %v423_v13  ;;  %v427_v31 = vadd.f32 %v426_v51, %v2957_v3  ;;  %v587_v38 = vadd.f32 %v586_v53, %v2957_v3 }
  0xe5   :  { %v2052_v56 = vmul.f32 -1.442695, %v425_v50  ;;  %v429_v57 = vadd.f32 %v428_v54, %v2951_v45  ;;  %v2084_v58 = vmul.f32 -1.442695, %v585_v52  ;;  %v589_v61 = vadd.f32 %v588_v55, %v2951_v45 }
  0xe6   :  { %v837_v40 = vmul.f32 0.2, %v583_v23  ;;  %vm773_vm3 = vcmp.ge.f32.partialorder %v583_v23, 0.0  ;;  %vm742_vm4 = vcmp.ge.f32.partialorder %v427_v31, 0.0  ;;  %v869_v47 = vsel %vm741_vm2, %v423_v13, %v805_v30 }
  0xe7   :  { %2482 = vpow2.f32 %v2052_v56  ;;  %v2053_v60 = vmul.f32 -1.442695, %v429_v57  ;;  %v2085_v63 = vmul.f32 -1.442695, %v589_v61  ;;  %v806_v48 = vmul.f32 0.2, %v427_v31 }
  0xe8   :  { %2484 = vpow2.f32 %v2084_v58  ;;  %v838_v50 = vmul.f32 0.2, %v587_v38  ;;  %v901_v55 = vsel %vm773_vm3, %v583_v23, %v837_v40  ;;  %vm774_vm5 = vcmp.ge.f32.partialorder %v587_v38, 0.0 }
  0xe9   :  { %2486 = vpow2.f32 %v2053_v60  ;;  %v432_v62 = vpop.f32.mrb[4].mxu0  ;;  %v592_v0 = vpop.f32.mrb[4].mxu1 }
  0xea   :  { %v434_v1 = vpop.f32.mrb[5].mxu0  ;;  %v594_v2 = vpop.f32.mrb[5].mxu1  ;;  %2488 = vpow2.f32 %v2085_v63  ;;  %v433_v39 = vadd.f32 %v432_v62, %v2957_v3  ;;  %v593_v43 = vadd.f32 %v592_v0, %v2957_v3 }
  0xeb   :  { %v435_v4 = vadd.f32 %v434_v1, %v2951_v45  ;;  %v436_v5 = vpop.f32.mrb[6].mxu0  ;;  %v595_v6 = vadd.f32 %v594_v2, %v2951_v45  ;;  %v2961_v7 = vpop.f32.mrb[6].mxu1 }
  0xec   :  { %v438_v8 = vpop.f32.mrb[7].mxu0  ;;  %v598_v9 = vpop.f32.mrb[7].mxu1  ;;  %v437_v44 = vadd.f32 %v436_v5, %v2957_v3  ;;  %v807_v52 = vmul.f32 0.2, %v433_v39  ;;  %vm743_vm6 = vcmp.ge.f32.partialorder %v433_v39, 0.0  ;;  %vm775_vm7 = vcmp.ge.f32.partialorder %v593_v43, 0.0 }
  0xed   :  { %v2054_v10 = vmul.f32 -1.442695, %v435_v4  ;;  %v439_v11 = vadd.f32 %v438_v8, %v2951_v45  ;;  %v2086_v12 = vmul.f32 -1.442695, %v595_v6  ;;  %v599_v15 = vadd.f32 %v598_v9, %v2951_v45 }
  0xee   :  { %v839_v60 = vmul.f32 0.2, %v593_v43  ;;  %v808_v63 = vmul.f32 0.2, %v437_v44  ;;  %v3000_v2 = vadd.f32 %v2961_v7, %v2957_v3  ;;  %v870_v6 = vsel %vm742_vm4, %v427_v31, %v806_v48 }
  0xef   :  { %2490 = vpow2.f32 %v2054_v10  ;;  %v2055_v14 = vmul.f32 -1.442695, %v439_v11  ;;  %v2087_v18 = vmul.f32 -1.442695, %v599_v15  ;;  %vm744_vm8 = vcmp.ge.f32.partialorder %v437_v44, 0.0 }
  0xf0   :  { %v871_v11 = vsel %vm743_vm6, %v433_v39, %v807_v52  ;;  %v3011_v15 = vsel %vm775_vm7, %v593_v43, %v839_v60  ;;  %v840_v23 = vmul.f32 0.2, %v3000_v2  ;;  %vm776_vm9 = vcmp.ge.f32.partialorder %v3000_v2, 0.0 }
  0xf1   :  { %v2483_v16 = vpop.eup %2482  ;;  %2492 = vpow2.f32 %v2055_v14  ;;  %v2966_v17 = vpop.f32.mrb[8].mxu0 }
  0xf2   :  { %v2968_v19 = vpop.f32.mrb[8].mxu1  ;;  %v2485_v20 = vpop.eup %2484  ;;  %v1125_v21 = vadd.f32 1.0, %v2483_v16  ;;  %2494 = vpow2.f32 %v2086_v12  ;;  %v902_v12 = vsel %vm774_vm5, %v587_v38, %v838_v50 }
  0xf3   :  { %v444_v22 = vpop.f32.mrb[9].mxu0  ;;  %v2971_v24 = vpop.f32.mrb[9].mxu1  ;;  %v1157_v28 = vadd.f32 1.0, %v2485_v20  ;;  %2496 = vpow2.f32 %v2087_v18  ;;  %v872_v20 = vsel %vm744_vm8, %v437_v44, %v808_v63 }
  0xf4   :  { %v2487_v25 = vpop.eup %2486  ;;  %v445_v26 = vadd.f32 %v444_v22, %v2951_v45  ;;  %v2974_v27 = vpop.f32.mrb[10].mxu0  ;;  %2498 = vrcp.f32 %v1125_v21  ;;  %v605_v13 = vadd.f32 %v2971_v24, %v2951_v45 }
  0xf5   :  { %v2976_v29 = vpop.f32.mrb[10].mxu1  ;;  %v1126_v32 = vadd.f32 1.0, %v2487_v25  ;;  %v448_v33 = vpop.f32.mrb[11].mxu0  ;;  %2500 = vrcp.f32 %v1157_v28  ;;  %v443_v28 = vadd.f32 %v2966_v17, %v2957_v3  ;;  %v447_v43 = vadd.f32 %v2974_v27, %v2957_v3 }
  0xf6   :  { %v2979_v34 = vpop.f32.mrb[11].mxu1  ;;  %v2489_v35 = vpop.eup %2488  ;;  %v2056_v36 = vmul.f32 -1.442695, %v445_v26  ;;  %v449_v37 = vadd.f32 %v448_v33, %v2951_v45 }
  0xf7   :  { %2502 = vrcp.f32 %v1126_v32  ;;  %v1158_v41 = vadd.f32 1.0, %v2489_v35  ;;  %v609_v31 = vadd.f32 %v2979_v34, %v2951_v45  ;;  %v809_v50 = vmul.f32 0.2, %v443_v28 }
  0xf8   :  { %2504 = vpow2.f32 %v2056_v36  ;;  %v2057_v42 = vmul.f32 -1.442695, %v449_v37  ;;  %v2088_v37 = vmul.f32 -1.442695, %v605_v13  ;;  %vm745_vm10 = vcmp.ge.f32.partialorder %v443_v28, 0.0 }
  0xf9   :  { %2506 = vrcp.f32 %v1158_v41  ;;  %v2491_v46 = vpop.eup %2490  ;;  %v2987_v49 = vpop.f32.mrb[12].mxu0  ;;  %vm746_vm11 = vcmp.ge.f32.partialorder %v447_v43, 0.0 }
  0xfa   :  { %2508 = vpow2.f32 %v2057_v42  ;;  %v2989_v51 = vpop.f32.mrb[12].mxu1  ;;  %v1127_v53 = vadd.f32 1.0, %v2491_v46  ;;  %v454_v54 = vpop.f32.mrb[13].mxu0 }
  0xfb   :  { %v2991_v56 = vpop.f32.mrb[13].mxu1  ;;  %v2493_v57 = vpop.eup %2492  ;;  %v455_v58 = vadd.f32 %v454_v54, %v2951_v45 }
  0xfc   :  { %v2994_v59 = vpop.f32.mrb[14].mxu0  ;;  %v2996_v61 = vpop.f32.mrb[14].mxu1  ;;  %2510 = vrcp.f32 %v1127_v53  ;;  %v1128_v0 = vadd.f32 1.0, %v2493_v57  ;;  %v2089_v53 = vmul.f32 -1.442695, %v609_v31 }
  0xfd   :  { %v2495_v62 = vpop.eup %2494  ;;  %v458_v1 = vpop.f32.mrb[15].mxu0  ;;  %v2058_v8 = vmul.f32 -1.442695, %v455_v58 }
  0xfe   :  { %v3002_v4 = vpop.f32.mrb[15].mxu1  ;;  %v2497_v5 = vpop.eup %2496  ;;  %v459_v9 = vadd.f32 %v458_v1, %v2951_v45  ;;  %2512 = vrcp.f32 %v1128_v0  ;;  %v1159_v16 = vadd.f32 1.0, %v2495_v62  ;;  %v810_v62 = vmul.f32 0.2, %v447_v43 }
  0xff   :  { %v2499_v10 = vpop.eup %2498  ;;  %2514 = vpow2.f32 %v2058_v8  ;;  %v1160_v24 = vadd.f32 1.0, %v2497_v5  ;;  %v904_v0 = vsel %vm776_vm9, %v3000_v2, %v840_v23 }
 0x100   :  { %v2501_v7 = vpop.eup %2500  ;;  %v1317_v14 = vmul.f32 %v2499_v10, %v869_v47  ;;  %v2059_v21 = vmul.f32 -1.442695, %v459_v9  ;;  %v603_v47 = vadd.f32 %v2968_v19, %v2957_v3  ;;  %v874_v23 = vsel %vm746_vm11, %v447_v43, %v810_v62 }
 0x101   :  { %v2503_v18 = vpop.eup %2502  ;;  %v1349_v22 = vmul.f32 %v2501_v7, %v901_v55  ;;  %v3016_v30 = vpop.f32.mrb[16].mxu0 }
 0x102   :  { %v2505_v25 = vpop.eup %2504  ;;  %v1318_v26 = vmul.f32 %v2503_v18, %v870_v6  ;;  %v3020_v32 = vpop.f32.mrb[16].mxu1  ;;  %2516 = vpow2.f32 %v2059_v21  ;;  %v873_v6 = vsel %vm745_vm10, %v443_v28, %v809_v50  ;;  %vm777_vm12 = vcmp.ge.f32.partialorder %v603_v47, 0.0 }
 0x103   :  { %v2507_v33 = vpop.eup %2506  ;;  %v1129_v35 = vadd.f32 1.0, %v2505_v25  ;;  %v464_v36 = vpop.f32.mrb[17].mxu0  ;;  %2518 = vrcp.f32 %v1159_v16 }
 0x104   :  { %v3023_v38 = vpop.f32.mrb[17].mxu1  ;;  %v2509_v39 = vpop.eup %2508  ;;  %v1381_v40 = vpack.c.bf16 %v1318_v26, %v1317_v14  ;;  %v465_v17 = vadd.f32 %v464_v36, %v2951_v45  ;;  %v1350_v42 = vmul.f32 %v2507_v33, %v902_v12  ;;  %v841_v12 = vmul.f32 0.2, %v603_v47 }
 0x105   :  { %v3026_v41 = vpop.f32.mrb[18].mxu0  ;;  %v3028_v34 = vpop.f32.mrb[18].mxu1  ;;  %2520 = vrcp.f32 %v1129_v35  ;;  %v1130_v44 = vadd.f32 1.0, %v2509_v39  ;;  %v3061_v26 = vadd.f32 %v2976_v29, %v2957_v3  ;;  %v453_v39 = vadd.f32 %v2987_v49, %v2957_v3 }
 0x106   :  { %v468_v46 = vpop.f32.mrb[19].mxu0  ;;  %v3034_v48 = vpop.f32.mrb[19].mxu1  ;;  %2248 = vst [vmem:[%s3701_s3] sm:$0xff] %v1381_v40   ;;  %v2060_v52 = vmul.f32 -1.442695, %v465_v17  ;;  %2522 = vrcp.f32 %v1160_v24  ;;  %v1397_v55 = vpack.c.bf16 %v1350_v42, %v1349_v22  ;;  %v1701_v57 = vunpack.c.l.bf16 %v1381_v40 }
 0x107   :  { %v2511_v54 = vpop.eup %2510  ;;  %2524 = vrcp.f32 %v1130_v44  ;;  %v469_v27 = vadd.f32 %v468_v46, %v2951_v45  ;;  %v1702_v58 = vunpack.c.h.bf16 %v1381_v40  ;;  %v457_v40 = vadd.f32 %v2994_v59, %v2957_v3 }
 0x108   :  { %v1319_v60 = vmul.f32 %v2511_v54, %v871_v11  ;;  %2526 = vpow2.f32 %v2088_v37  ;;  %v2513_v19 = vpop.eup %2512  ;;  %2419 = vst [vmem:[%s3701_s3 + $0x80] sm:$0xff] %v1397_v55   ;;  %v1835_v7 = vmul.f32 %v1701_v57, %v1701_v57  ;;  %v3074_v17 = vsel %vm777_vm12, %v603_v47, %v841_v12 }
 0x109   :  { %2528 = vpow2.f32 %v2060_v52  ;;  %v2061_v63 = vmul.f32 -1.442695, %v469_v27  ;;  %v2515_v1 = vpop.eup %2514  ;;  %v1320_v5 = vmul.f32 %v2513_v19, %v872_v20  ;;  %v3047_v8 = vpop.f32.mrb[20].mxu0  ;;  %v1836_v14 = vmul.f32 %v1702_v58, %v1702_v58 }
 0x10a   :  { %2530 = vpow2.f32 %v2089_v53  ;;  %v3049_v9 = vpop.f32.mrb[20].mxu1  ;;  %v1131_v10 = vadd.f32 1.0, %v2515_v1  ;;  %v474_v11 = vpop.f32.mrb[21].mxu0  ;;  %v1765_v22 = vadd.f32 %v1702_v58, %v1701_v57  ;;  %vm747_vm13 = vcmp.ge.f32.partialorder %v453_v39, 0.0 }
 0x10b   :  { %2532 = vpow2.f32 %v2061_v63  ;;  %v3051_v13 = vpop.f32.mrb[21].mxu1  ;;  %v1382_v2 = vpack.c.bf16 %v1320_v5, %v1319_v60  ;;  %v475_v16 = vadd.f32 %v474_v11, %v2951_v45  ;;  %v3054_v18 = vpop.f32.mrb[22].mxu0  ;;  %v1899_v43 = vadd.f32 %v1836_v14, %v1835_v7 }
 0x10c   :  { %v3056_v20 = vpop.f32.mrb[22].mxu1  ;;  %v2517_v21 = vpop.eup %2516  ;;  %2534 = vrcp.f32 %v1131_v10  ;;  %v811_v19 = vmul.f32 0.2, %v453_v39  ;;  %vm748_vm14 = vcmp.ge.f32.partialorder %v457_v40, 0.0  ;;  %vm778_vm15 = vcmp.ge.f32.partialorder %v3061_v26, 0.0 }
 0x10d   :  { %v478_v25 = vpop.f32.mrb[23].mxu0  ;;  %v3063_v28 = vpop.f32.mrb[23].mxu1  ;;  %2404 = vst [vmem:[%s3701_s3 + $0x8] sm:$0xff] %v1382_v2   ;;  %v1703_v31 = vunpack.c.l.bf16 %v1382_v2  ;;  %v1704_v33 = vunpack.c.h.bf16 %v1382_v2  ;;  %v1132_v35 = vadd.f32 1.0, %v2517_v21  ;;  %v2062_v36 = vmul.f32 -1.442695, %v475_v16 }
 0x10e   :  { %v2519_v24 = vpop.eup %2518  ;;  %v479_v29 = vadd.f32 %v478_v25, %v2951_v45  ;;  %v812_v2 = vmul.f32 0.2, %v457_v40  ;;  %v3090_v16 = vadd.f32 %v3016_v30, %v2957_v3 }
 0x10f   :  { %v2521_v37 = vpop.eup %2520  ;;  %v1766_v44 = vadd.f32 %v1765_v22, %v1703_v31  ;;  %v1837_v46 = vmul.f32 %v1703_v31, %v1703_v31  ;;  %v1838_v53 = vmul.f32 %v1704_v33, %v1704_v33  ;;  %2536 = vrcp.f32 %v1132_v35 }
 0x110   :  { %v2523_v42 = vpop.eup %2522  ;;  %v1321_v50 = vmul.f32 %v2521_v37, %v873_v6  ;;  %v2063_v54 = vmul.f32 -1.442695, %v479_v29  ;;  %v1351_v27 = vmul.f32 %v2519_v24, %v3011_v15  ;;  %2538 = vpow2.f32 %v2062_v36 }
 0x111   :  { %v2525_v52 = vpop.eup %2524  ;;  %v1767_v55 = vadd.f32 %v1766_v44, %v1704_v33  ;;  %v1900_v57 = vadd.f32 %v1899_v43, %v1837_v46  ;;  %v3077_v58 = vpop.f32.mrb[24].mxu0  ;;  %v1352_v62 = vmul.f32 %v2523_v42, %v904_v0  ;;  %v875_v33 = vsel %vm747_vm13, %v453_v39, %v811_v19 }
 0x112   :  { %v2527_v49 = vpop.eup %2526  ;;  %v1322_v59 = vmul.f32 %v2525_v52, %v874_v23  ;;  %v3079_v47 = vpop.f32.mrb[24].mxu1  ;;  %2540 = vpow2.f32 %v2063_v54  ;;  %v467_v42 = vadd.f32 %v3026_v41, %v2957_v3  ;;  %v876_v43 = vsel %vm748_vm14, %v457_v40, %v812_v2 }
 0x113   :  { %v2529_v60 = vpop.eup %2528  ;;  %v484_v63 = vpop.f32.mrb[25].mxu0  ;;  %v1901_v6 = vadd.f32 %v1900_v57, %v1838_v53  ;;  %v1398_v0 = vpack.c.bf16 %v1352_v62, %v1351_v27  ;;  %v1161_v35 = vadd.f32 1.0, %v2527_v49  ;;  %vm749_vm0 = vcmp.ge.f32.partialorder %v3090_v16, 0.0 }
 0x114   :  { %v3081_v1 = vpop.f32.mrb[25].mxu1  ;;  %v2531_v5 = vpop.eup %2530  ;;  %v1383_v15 = vpack.c.bf16 %v1322_v59, %v1321_v50  ;;  %v1133_v10 = vadd.f32 1.0, %v2529_v60  ;;  %v485_v11 = vadd.f32 %v484_v63, %v2951_v45  ;;  %v842_v39 = vmul.f32 0.2, %v3061_v26 }
 0x115   :  { %v3084_v12 = vpop.f32.mrb[26].mxu0  ;;  %v3086_v7 = vpop.f32.mrb[26].mxu1  ;;  %2420 = vst [vmem:[%s3701_s3 + $0x88] sm:$0xff] %v1398_v0   ;;  %v813_v27 = vmul.f32 0.2, %v3090_v16  ;;  %v1162_v40 = vadd.f32 1.0, %v2531_v5  ;;  %v473_v0 = vadd.f32 %v3047_v8, %v2957_v3 }
 0x116   :  { %v2533_v14 = vpop.eup %2532  ;;  %v488_v21 = vpop.f32.mrb[27].mxu0  ;;  %2405 = vst [vmem:[%s3701_s3 + $0x10] sm:$0xff] %v1383_v15   ;;  %v1705_v23 = vunpack.c.l.bf16 %v1383_v15  ;;  %v1706_v25 = vunpack.c.h.bf16 %v1383_v15  ;;  %2542 = vrcp.f32 %v1133_v10  ;;  %v2064_v30 = vmul.f32 -1.442695, %v485_v11 }
 0x117   :  { %v3092_v22 = vpop.f32.mrb[27].mxu1  ;;  %v1134_v24 = vadd.f32 1.0, %v2533_v14  ;;  %v2535_v31 = vpop.eup %2534  ;;  %v489_v41 = vadd.f32 %v488_v21, %v2951_v45  ;;  %v814_v19 = vmul.f32 0.2, %v467_v42  ;;  %vm750_vm1 = vcmp.ge.f32.partialorder %v467_v42, 0.0 }
 0x118   :  { %v1768_v36 = vadd.f32 %v1767_v55, %v1705_v23  ;;  %v1839_v37 = vmul.f32 %v1705_v23, %v1705_v23  ;;  %v1323_v29 = vmul.f32 %v2535_v31, %v875_v33  ;;  %v1840_v46 = vmul.f32 %v1706_v25, %v1706_v25 }
 0x119   :  { %2544 = vrcp.f32 %v1134_v24  ;;  %v3107_v52 = vpop.f32.mrb[28].mxu0  ;;  %v3109_v53 = vpop.f32.mrb[28].mxu1  ;;  %v2065_v11 = vmul.f32 -1.442695, %v489_v41  ;;  %v615_v31 = vadd.f32 %v2991_v56, %v2951_v45  ;;  %v877_v8 = vsel %vm749_vm0, %v3090_v16, %v813_v27 }
 0x11a   :  { %v1769_v44 = vadd.f32 %v1768_v36, %v1706_v25  ;;  %v1902_v50 = vadd.f32 %v1901_v6, %v1839_v37  ;;  %2546 = vpow2.f32 %v2064_v30  ;;  %v2537_v54 = vpop.eup %2536  ;;  %v494_v49 = vpop.f32.mrb[29].mxu0  ;;  %v477_v25 = vadd.f32 %v3054_v18, %v2957_v3 }
 0x11b   :  { %2548 = vrcp.f32 %v1161_v35  ;;  %v3113_v55 = vpop.f32.mrb[29].mxu1  ;;  %v2539_v57 = vpop.eup %2538  ;;  %v1324_v60 = vmul.f32 %v2537_v54, %v876_v43  ;;  %v495_v62 = vadd.f32 %v494_v49, %v2951_v45  ;;  %v878_v18 = vsel %vm750_vm1, %v467_v42, %v814_v19 }
 0x11c   :  { %v1903_v59 = vadd.f32 %v1902_v50, %v1840_v46  ;;  %v3116_v63 = vpop.f32.mrb[30].mxu0  ;;  %v3118_v6 = vpop.f32.mrb[30].mxu1  ;;  %v1135_v10 = vadd.f32 1.0, %v2539_v57  ;;  %2550 = vrcp.f32 %v1162_v40  ;;  %v906_v56 = vsel %vm778_vm15, %v3061_v26, %v842_v39 }
 0x11d   :  { %v2541_v15 = vpop.eup %2540  ;;  %v498_v14 = vpop.f32.mrb[31].mxu0  ;;  %v1384_v2 = vpack.c.bf16 %v1324_v60, %v1323_v29  ;;  %v2066_v23 = vmul.f32 -1.442695, %v495_v62  ;;  %v815_v43 = vmul.f32 0.2, %v473_v0  ;;  %vm751_vm2 = vcmp.ge.f32.partialorder %v473_v0, 0.0 }
 0x11e   :  { %v3120_v5 = vpop.f32.mrb[31].mxu1  ;;  %v1136_v21 = vadd.f32 1.0, %v2541_v15  ;;  %2552 = vrcp.f32 %v1135_v10  ;;  %v499_v24 = vadd.f32 %v498_v14, %v2951_v45  ;;  %vm752_vm3 = vcmp.ge.f32.partialorder %v477_v25, 0.0 }
 0x11f   :  { %2406 = vst [vmem:[%s3701_s3 + $0x18] sm:$0xff] %v1384_v2   ;;  %v1707_v30 = vunpack.c.l.bf16 %v1384_v2  ;;  %v1708_v35 = vunpack.c.h.bf16 %v1384_v2  ;;  %v2090_v27 = vmul.f32 -1.442695, %v615_v31  ;;  %v483_v19 = vadd.f32 %v3077_v58, %v2957_v3 }
 0x120   :  { %v2543_v33 = vpop.eup %2542  ;;  %2554 = vrcp.f32 %v1136_v21  ;;  %v2067_v16 = vmul.f32 -1.442695, %v499_v24  ;;  %v619_v24 = vadd.f32 %v3002_v4, %v2951_v45  ;;  %v3163_v4 = vadd.f32 %v3084_v12, %v2957_v3 }
 0x121   :  { %v1325_v36 = vmul.f32 %v2543_v33, %v877_v8  ;;  %2556 = vpow2.f32 %v2065_v11  ;;  %v1770_v37 = vadd.f32 %v1769_v44, %v1707_v30  ;;  %v1841_v29 = vmul.f32 %v1707_v30, %v1707_v30  ;;  %v3139_v46 = vpop.f32.mrb[32].mxu0  ;;  %v3141_v50 = vpop.f32.mrb[32].mxu1 }
 0x122   :  { %2558 = vpow2.f32 %v2066_v23  ;;  %v1842_v40 = vmul.f32 %v1708_v35, %v1708_v35  ;;  %v504_v60 = vpop.f32.mrb[33].mxu0  ;;  %v3143_v26 = vpop.f32.mrb[33].mxu1  ;;  %v816_v44 = vmul.f32 0.2, %v477_v25  ;;  %v879_v33 = vsel %vm751_vm2, %v473_v0, %v815_v43 }
 0x123   :  { %v2545_v54 = vpop.eup %2544  ;;  %v1771_v42 = vadd.f32 %v1770_v37, %v1708_v35  ;;  %v1904_v49 = vadd.f32 %v1903_v59, %v1841_v29  ;;  %2560 = vpow2.f32 %v2067_v16  ;;  %v3147_v15 = vpop.f32.mrb[34].mxu0  ;;  %vm753_vm4 = vcmp.ge.f32.partialorder %v483_v19, 0.0 }
 0x124   :  { %v2547_v41 = vpop.eup %2546  ;;  %v1326_v57 = vmul.f32 %v2545_v54, %v878_v18  ;;  %v3149_v10 = vpop.f32.mrb[34].mxu1  ;;  %2562 = vpow2.f32 %v2090_v27  ;;  %v817_v8 = vmul.f32 0.2, %v483_v19  ;;  %vm754_vm5 = vcmp.ge.f32.partialorder %v3163_v4, 0.0 }
 0x125   :  { %v2549_v39 = vpop.eup %2548  ;;  %v1137_v62 = vadd.f32 1.0, %v2547_v41  ;;  %v1905_v11 = vadd.f32 %v1904_v49, %v1842_v40  ;;  %v508_v59 = vpop.f32.mrb[35].mxu0 }
 0x126   :  { %v1385_v14 = vpack.c.bf16 %v1326_v57, %v1325_v36  ;;  %v1353_v2 = vmul.f32 %v2549_v39, %v3074_v17  ;;  %v3152_v21 = vpop.f32.mrb[35].mxu1  ;;  %v2551_v23 = vpop.eup %2550  ;;  %v880_v17 = vsel %vm752_vm3, %v477_v25, %v816_v44  ;;  %v2091_v36 = vmul.f32 -1.442695, %v619_v24 }
 0x127   :  { %2564 = vrcp.f32 %v1137_v62  ;;  %v1354_v30 = vmul.f32 %v2551_v23, %v906_v56  ;;  %v505_v25 = vadd.f32 %v504_v60, %v2951_v45 }
 0x128   :  { %2407 = vst [vmem:[%s3701_s3 + $0x20] sm:$0xff] %v1385_v14   ;;  %v1709_v58 = vunpack.c.l.bf16 %v1385_v14  ;;  %v1710_v31 = vunpack.c.h.bf16 %v1385_v14  ;;  %v2553_v35 = vpop.eup %2552  ;;  %2566 = vpow2.f32 %v2091_v36 }
 0x129   :  { %v1327_v54 = vmul.f32 %v2553_v35, %v879_v33  ;;  %v3165_v16 = vpop.f32.mrb[36].mxu0  ;;  %v3167_v27 = vpop.f32.mrb[36].mxu1  ;;  %v1399_v43 = vpack.c.bf16 %v1354_v30, %v1353_v2  ;;  %v818_v35 = vmul.f32 0.2, %v3163_v4 }
 0x12a   :  { %v2555_v18 = vpop.eup %2554  ;;  %v1772_v37 = vadd.f32 %v1771_v42, %v1709_v58  ;;  %v1843_v29 = vmul.f32 %v1709_v58, %v1709_v58  ;;  %v3170_v41 = vpop.f32.mrb[37].mxu0  ;;  %v1844_v57 = vmul.f32 %v1710_v31, %v1710_v31  ;;  %v881_v58 = vsel %vm753_vm4, %v483_v19, %v817_v8 }
 0x12b   :  { %v2557_v0 = vpop.eup %2556  ;;  %v1328_v56 = vmul.f32 %v2555_v18, %v880_v17  ;;  %v3172_v40 = vpop.f32.mrb[37].mxu1  ;;  %2421 = vst [vmem:[%s3701_s3 + $0x90] sm:$0xff] %v1399_v43   ;;  %v2068_v19 = vmul.f32 -1.442695, %v505_v25  ;;  %v509_v8 = vadd.f32 %v508_v59, %v2951_v45  ;;  %v625_v59 = vadd.f32 %v3023_v38, %v2951_v45 }
 0x12c   :  { %v2559_v42 = vpop.eup %2558  ;;  %v1773_v49 = vadd.f32 %v1772_v37, %v1710_v31  ;;  %v1906_v39 = vadd.f32 %v1905_v11, %v1843_v29  ;;  %v1138_v12 = vadd.f32 1.0, %v2557_v0  ;;  %v3174_v44 = vpop.f32.mrb[38].mxu0  ;;  %v3186_v11 = vadd.f32 %v2989_v51, %v2957_v3 }
 0x12d   :  { %v3176_v62 = vpop.f32.mrb[38].mxu1  ;;  %v1386_v14 = vpack.c.bf16 %v1328_v56, %v1327_v54  ;;  %v1139_v2 = vadd.f32 1.0, %v2559_v42  ;;  %v518_v60 = vpop.f32.mrb[39].mxu0  ;;  %v493_v29 = vadd.f32 %v3107_v52, %v2957_v3  ;;  %v2069_v43 = vmul.f32 -1.442695, %v509_v8 }
 0x12e   :  { %v3181_v23 = vpop.f32.mrb[39].mxu1  ;;  %v1907_v24 = vadd.f32 %v1906_v39, %v1844_v57  ;;  %2568 = vrcp.f32 %v1138_v12  ;;  %v2561_v31 = vpop.eup %2560  ;;  %v497_v52 = vadd.f32 %v3116_v63, %v2957_v3  ;;  %v2092_v38 = vmul.f32 -1.442695, %v625_v59 }
 0x12f   :  { %2408 = vst [vmem:[%s3701_s3 + $0x28] sm:$0xff] %v1386_v14   ;;  %v1711_v33 = vunpack.c.l.bf16 %v1386_v14  ;;  %v1712_v30 = vunpack.c.h.bf16 %v1386_v14  ;;  %v2563_v17 = vpop.eup %2562  ;;  %2570 = vrcp.f32 %v1139_v2  ;;  %v1140_v36 = vadd.f32 1.0, %v2561_v31 }
 0x130   :  { %v1163_v54 = vadd.f32 1.0, %v2563_v17  ;;  %v617_v14 = vadd.f32 %v2996_v61, %v2957_v3  ;;  %v882_v61 = vsel %vm754_vm5, %v3163_v4, %v818_v35  ;;  %vm755_vm6 = vcmp.ge.f32.partialorder %v493_v29, 0.0 }
 0x131   :  { %v2565_v18 = vpop.eup %2564  ;;  %v1774_v51 = vadd.f32 %v1773_v49, %v1711_v33  ;;  %v1845_v37 = vmul.f32 %v1711_v33, %v1711_v33  ;;  %v1846_v0 = vmul.f32 %v1712_v30, %v1712_v30  ;;  %2572 = vrcp.f32 %v1140_v36  ;;  %v3196_v42 = vpop.f32.mrb[40].mxu0 }
 0x132   :  { %v1329_v56 = vmul.f32 %v2565_v18, %v881_v58  ;;  %v3198_v57 = vpop.f32.mrb[40].mxu1  ;;  %2574 = vrcp.f32 %v1163_v54  ;;  %v3204_v49 = vpop.f32.mrb[41].mxu0  ;;  %v629_v33 = vadd.f32 %v3034_v48, %v2951_v45  ;;  %v819_v63 = vmul.f32 0.2, %v493_v29 }
 0x133   :  { %3706 = vst [vmem:[#allocation2_spill] sm:$0xff] %v3198_v57  ;;  %v3200_v39 = vadd.f32 %v1774_v51, %v1712_v30  ;;  %v1908_v25 = vadd.f32 %v1907_v24, %v1845_v37  ;;  %v3206_v12 = vpop.f32.mrb[41].mxu1  ;;  %2576 = vpow2.f32 %v2068_v19  ;;  %v3212_v2 = vpop.f32.mrb[42].mxu0  ;;  %v843_v19 = vmul.f32 0.2, %v3186_v11 }
 0x134   :  { %v3214_v58 = vpop.f32.mrb[42].mxu1  ;;  %v2567_v24 = vpop.eup %2566  ;;  %2578 = vpow2.f32 %v2069_v43  ;;  %v2093_v8 = vmul.f32 -1.442695, %v629_v33  ;;  %v515_v18 = vadd.f32 %v3170_v41, %v2951_v45  ;;  %v820_v48 = vmul.f32 0.2, %v497_v52 }
 0x135   :  { %3707 = vst [vmem:[#allocation3_spill] sm:$0xff] %v3214_v58  ;;  %v3216_v31 = vadd.f32 %v1908_v25, %v1846_v0  ;;  %v3220_v30 = vpop.f32.mrb[43].mxu0  ;;  %v3222_v17 = vpop.f32.mrb[43].mxu1  ;;  %v1164_v36 = vadd.f32 1.0, %v2567_v24  ;;  %2580 = vpow2.f32 %v2092_v38  ;;  %vm779_vm7 = vcmp.ge.f32.partialorder %v3186_v11, 0.0 }
 0x136   :  { %v519_v37 = vadd.f32 %v518_v60, %v2951_v45  ;;  %vm756_vm8 = vcmp.ge.f32.partialorder %v497_v52, 0.0  ;;  %v883_v35 = vsel %vm755_vm6, %v493_v29, %v819_v63  ;;  %vm780_vm9 = vcmp.ge.f32.partialorder %v617_v14, 0.0 }
 0x137   :  { %2582 = vrcp.f32 %v1164_v36  ;;  %v844_v0 = vmul.f32 0.2, %v617_v14  ;;  %v2070_v43 = vmul.f32 -1.442695, %v515_v18  ;;  %v907_v24 = vsel %vm779_vm7, %v3186_v11, %v843_v19 }
 0x138   :  { %v2569_v51 = vpop.eup %2568  ;;  %2584 = vpow2.f32 %v2093_v8  ;;  %v2071_v38 = vmul.f32 -1.442695, %v519_v37  ;;  %v3242_v8 = vadd.f32 %v3139_v46, %v2957_v3 }
 0x139   :  { %v1330_v54 = vmul.f32 %v2569_v51, %v882_v61  ;;  %v2571_v4 = vpop.eup %2570  ;;  %v3233_v25 = vpop.f32.mrb[44].mxu0  ;;  %v884_v61 = vsel %vm756_vm8, %v497_v52, %v820_v48  ;;  %2586 = vpow2.f32 %v2070_v43  ;;  %v908_v37 = vsel %vm780_vm9, %v617_v14, %v844_v0 }
 0x13a   :  { %v1331_v41 = vmul.f32 %v2571_v4, %v883_v35  ;;  %v3236_v33 = vpop.f32.mrb[45].mxu0  ;;  %v3238_v36 = vpop.f32.mrb[44].mxu1  ;;  %2588 = vpow2.f32 %v2071_v38  ;;  %vm757_vm10 = vcmp.ge.f32.partialorder %v3242_v8, 0.0 }
 0x13b   :  { %v1387_v59 = vpack.c.bf16 %v1330_v54, %v1329_v56  ;;  %3708 = vst [vmem:[#allocation4_spill] sm:$0xff] %v3238_v36  ;;  %v2573_v60 = vpop.eup %2572  ;;  %v3244_v29 = vpop.f32.mrb[46].mxu0 }
 0x13c   :  { %v3246_v63 = vpop.f32.mrb[45].mxu1  ;;  %v2575_v56 = vpop.eup %2574  ;;  %v1332_v18 = vmul.f32 %v2573_v60, %v884_v61  ;;  %v3264_v61 = vadd.f32 %v3147_v15, %v2957_v3  ;;  %v639_v15 = vadd.f32 %v3063_v28, %v2951_v45 }
 0x13d   :  { %2409 = vst [vmem:[%s3701_s3 + $0x30] sm:$0xff] %v1387_v59   ;;  %v1713_v11 = vunpack.c.l.bf16 %v1387_v59  ;;  %v1714_v19 = vunpack.c.h.bf16 %v1387_v59  ;;  %v3251_v51 = vpop.f32.mrb[47].mxu0  ;;  %v3253_v52 = vpop.f32.mrb[46].mxu1  ;;  %v1355_v48 = vmul.f32 %v2575_v56, %v907_v24  ;;  %v635_v59 = vadd.f32 %v3051_v13, %v2951_v45 }
 0x13e   :  { %3709 = vst [vmem:[#allocation5_spill] sm:$0xff] %v3253_v52  ;;  %v2577_v46 = vpop.eup %2576  ;;  %v3256_v54 = vpop.f32.mrb[47].mxu1  ;;  %v1388_v36 = vpack.c.bf16 %v1332_v18, %v1331_v41  ;;  %vm758_vm11 = vcmp.ge.f32.partialorder %v3264_v61, 0.0 }
 0x13f   :  { %3710 = vst [vmem:[#allocation6_spill] sm:$0xff] %v3256_v54  ;;  %v2579_v4 = vpop.eup %2578  ;;  %v1776_v35 = vadd.f32 %v3200_v39, %v1713_v11  ;;  %v1847_v43 = vmul.f32 %v1713_v11, %v1713_v11  ;;  %v1848_v60 = vmul.f32 %v1714_v19, %v1714_v19  ;;  %v1141_v38 = vadd.f32 1.0, %v2577_v46 }
 0x140   :  { %v1142_v24 = vadd.f32 1.0, %v2579_v4  ;;  %v2581_v14 = vpop.eup %2580  ;;  %2410 = vst [vmem:[%s3701_s3 + $0x38] sm:$0xff] %v1388_v36   ;;  %v1715_v39 = vunpack.c.l.bf16 %v1388_v36  ;;  %v1716_v41 = vunpack.c.h.bf16 %v1388_v36  ;;  %v3272_v11 = vadd.f32 %v3020_v32, %v2957_v3 }
 0x141   :  { %v1777_v0 = vadd.f32 %v1776_v35, %v1714_v19  ;;  %v1910_v56 = vadd.f32 %v3216_v31, %v1847_v43  ;;  %v2583_v13 = vpop.eup %2582  ;;  %2590 = vrcp.f32 %v1141_v38  ;;  %v1165_v18 = vadd.f32 1.0, %v2581_v14  ;;  %v3276_v46 = vpop.f32.mrb[48].mxu0 }
 0x142   :  { %v3278_v19 = vpop.f32.mrb[48].mxu1  ;;  %v2585_v31 = vpop.eup %2584  ;;  %v1849_v43 = vmul.f32 %v1715_v39, %v1715_v39  ;;  %v2094_v52 = vmul.f32 -1.442695, %v635_v59  ;;  %v1850_v58 = vmul.f32 %v1716_v41, %v1716_v41  ;;  %v1356_v32 = vmul.f32 %v2583_v13, %v908_v37 }
 0x143   :  { %3711 = vst [vmem:[#allocation7_spill] sm:$0xff] %v3278_v19  ;;  %v1911_v4 = vadd.f32 %v1910_v56, %v1848_v60  ;;  %v1778_v35 = vadd.f32 %v1777_v0, %v1715_v39  ;;  %v3280_v36 = vpop.f32.mrb[49].mxu0  ;;  %v3282_v38 = vpop.f32.mrb[49].mxu1  ;;  %2592 = vrcp.f32 %v1142_v24  ;;  %v1166_v14 = vadd.f32 1.0, %v2585_v31 }
 0x144   :  { %v3284_v57 = vpop.f32.mrb[50].mxu0  ;;  %v3286_v28 = vpop.f32.mrb[50].mxu1  ;;  %2594 = vrcp.f32 %v1165_v18  ;;  %v2095_v60 = vmul.f32 -1.442695, %v639_v15  ;;  %v1400_v39 = vpack.c.bf16 %v1356_v32, %v1355_v48  ;;  %v627_v37 = vadd.f32 %v3028_v34, %v2957_v3 }
 0x145   :  { %3712 = vst [vmem:[#allocation8_spill] sm:$0xff] %v3286_v28  ;;  %v3288_v54 = vadd.f32 %v1778_v35, %v1716_v41  ;;  %v1912_v19 = vadd.f32 %v1911_v4, %v1849_v43  ;;  %v3290_v0 = vpop.f32.mrb[51].mxu0  ;;  %v3292_v59 = vpop.f32.mrb[51].mxu1  ;;  %2596 = vrcp.f32 %v1166_v14  ;;  %v525_v24 = vadd.f32 %v3204_v49, %v2951_v45 }
 0x146   :  { %v2587_v56 = vpop.eup %2586  ;;  %v821_v41 = vmul.f32 0.2, %v3242_v8  ;;  %2598 = vpow2.f32 %v2094_v52  ;;  %2422 = vst [vmem:[%s3701_s3 + $0x98] sm:$0xff] %v1400_v39   ;;  %v822_v48 = vmul.f32 0.2, %v3264_v61  ;;  %v513_v34 = vadd.f32 %v3165_v16, %v2957_v3 }
 0x147   :  { %v2589_v13 = vpop.eup %2588  ;;  %v3298_v31 = vadd.f32 %v1912_v19, %v1850_v58  ;;  %v1143_v18 = vadd.f32 1.0, %v2587_v56  ;;  %2600 = vpow2.f32 %v2095_v60  ;;  %v845_v49 = vmul.f32 0.2, %v3272_v11 }
 0x148   :  { %v1144_v15 = vadd.f32 1.0, %v2589_v13  ;;  %v2072_v58 = vmul.f32 -1.442695, %v525_v24  ;;  %vm781_vm12 = vcmp.ge.f32.partialorder %v3272_v11, 0.0  ;;  %v846_v52 = vmul.f32 0.2, %v627_v37 }
 0x149   :  { %2602 = vrcp.f32 %v1143_v18  ;;  %v517_v19 = vadd.f32 %v3174_v44, %v2957_v3  ;;  %v3312_v4 = vpop.f32.mrb[52].mxu0  ;;  %v3314_v35 = vpop.f32.mrb[52].mxu1  ;;  %v885_v16 = vsel %vm757_vm10, %v3242_v8, %v821_v41  ;;  %vm782_vm13 = vcmp.ge.f32.partialorder %v627_v37, 0.0 }
 0x14a   :  { %2604 = vrcp.f32 %v1144_v15  ;;  %3713 = vst [vmem:[#allocation9_spill] sm:$0xff] %v3314_v35  ;;  %v529_v43 = vadd.f32 %v3220_v30, %v2951_v45  ;;  %v3321_v32 = vpop.f32.mrb[53].mxu0  ;;  %v3323_v14 = vpop.f32.mrb[53].mxu1  ;;  %v886_v44 = vsel %vm758_vm11, %v3264_v61, %v822_v48  ;;  %v823_v56 = vmul.f32 0.2, %v513_v34 }
 0x14b   :  { %2606 = vpow2.f32 %v2072_v58  ;;  %3714 = vst [vmem:[#allocation10_spill] sm:$0xff] %v3323_v14  ;;  %v2591_v60 = vpop.eup %2590  ;;  %v645_v39 = vadd.f32 %v3081_v1, %v2951_v45  ;;  %v649_v8 = vadd.f32 %v3092_v22, %v2951_v45  ;;  %v3332_v24 = vpop.f32.mrb[54].mxu0  ;;  %v909_v41 = vsel %vm781_vm12, %v3272_v11, %v845_v49 }
 0x14c   :  { %v3334_v13 = vpop.f32.mrb[54].mxu1  ;;  %v1333_v30 = vmul.f32 %v2591_v60, %v885_v16  ;;  %vm759_vm14 = vcmp.ge.f32.partialorder %v513_v34, 0.0  ;;  %v2073_v18 = vmul.f32 -1.442695, %v529_v43  ;;  %v3339_v15 = vpop.f32.mrb[55].mxu0  ;;  %v910_v1 = vsel %vm782_vm13, %v627_v37, %v846_v52 }
 0x14d   :  { %3715 = vst [vmem:[#allocation11_spill] sm:$0xff] %v3334_v13  ;;  %v3341_v61 = vpop.f32.mrb[55].mxu1  ;;  %v2593_v48 = vpop.eup %2592  ;;  %v824_v58 = vmul.f32 0.2, %v517_v19  ;;  %v633_v22 = vadd.f32 %v3049_v9, %v2957_v3  ;;  %v2096_v35 = vmul.f32 -1.442695, %v645_v39  ;;  %v887_v43 = vsel %vm759_vm14, %v513_v34, %v823_v56 }
 0x14e   :  { %3716 = vst [vmem:[#allocation12_spill] sm:$0xff] %v3341_v61  ;;  %v2595_v13 = vpop.eup %2594  ;;  %v1334_v16 = vmul.f32 %v2593_v48, %v886_v44  ;;  %vm760_vm15 = vcmp.ge.f32.partialorder %v517_v19, 0.0  ;;  %2608 = vpow2.f32 %v2073_v18  ;;  %v2097_v60 = vmul.f32 -1.442695, %v649_v8 }
 0x14f   :  { %v2597_v11 = vpop.eup %2596  ;;  %v1357_v49 = vmul.f32 %v2595_v13, %v909_v41  ;;  %2610 = vpow2.f32 %v2096_v35  ;;  %v637_v37 = vadd.f32 %v3056_v20, %v2957_v3  ;;  %v888_v9 = vsel %vm760_vm15, %v517_v19, %v824_v58 }
 0x150   :  { %v2599_v28 = vpop.eup %2598  ;;  %v1389_v61 = vpack.c.bf16 %v1334_v16, %v1333_v30  ;;  %v1358_v14 = vmul.f32 %v2597_v11, %v910_v1  ;;  %2612 = vpow2.f32 %v2097_v60  ;;  %vm783_vm0 = vcmp.ge.f32.partialorder %v633_v22, 0.0 }
 0x151   :  { %v2601_v52 = vpop.eup %2600  ;;  %v1167_v39 = vadd.f32 1.0, %v2599_v28  ;;  %v535_v44 = vadd.f32 %v3236_v33, %v2951_v45  ;;  %v3351_v8 = vpop.f32.mrb[56].mxu0  ;;  %v847_v18 = vmul.f32 0.2, %v633_v22  ;;  %vm784_vm1 = vcmp.ge.f32.partialorder %v637_v37, 0.0 }
 0x152   :  { %v3353_v13 = vpop.f32.mrb[56].mxu1  ;;  %2411 = vst [vmem:[%s3701_s3 + $0x40] sm:$0xff] %v1389_v61   ;;  %v1717_v35 = vunpack.c.l.bf16 %v1389_v61  ;;  %v1718_v56 = vunpack.c.h.bf16 %v1389_v61  ;;  %v3358_v20 = vpack.c.bf16 %v1358_v14, %v1357_v49  ;;  %v1168_v30 = vadd.f32 1.0, %v2601_v52  ;;  %v3360_v19 = vpop.f32.mrb[57].mxu0 }
 0x153   :  { %3717 = vst [vmem:[#allocation13_spill] sm:$0xff] %v3353_v13  ;;  %v2603_v34 = vpop.eup %2602  ;;  %v3362_v28 = vpop.f32.mrb[57].mxu1  ;;  %2614 = vrcp.f32 %v1167_v39  ;;  %v2074_v48 = vmul.f32 -1.442695, %v535_v44  ;;  %v848_v14 = vmul.f32 0.2, %v637_v37  ;;  %v523_v52 = vadd.f32 %v3196_v42, %v2957_v3 }
 0x154   :  { %3718 = vst [vmem:[#allocation14_spill] sm:$0xff] %v3358_v20  ;;  %3719 = vst [vmem:[#allocation15_spill] sm:$0xff] %v3362_v28  ;;  %v2605_v41 = vpop.eup %2604  ;;  %v1335_v33 = vmul.f32 %v2603_v34, %v887_v43  ;;  %v3364_v1 = vpop.f32.mrb[58].mxu0  ;;  %v1780_v60 = vadd.f32 %v3288_v54, %v1717_v35  ;;  %v1851_v61 = vmul.f32 %v1717_v35, %v1717_v35  ;;  %2616 = vrcp.f32 %v1168_v30 }
 0x155   :  { %v3366_v58 = vpop.f32.mrb[58].mxu1  ;;  %v2607_v16 = vpop.eup %2606  ;;  %2423 = vst [vmem:[%s3701_s3 + $0xa0] sm:$0xff] %v3358_v20   ;;  %v1336_v43 = vmul.f32 %v2605_v41, %v888_v9  ;;  %v1852_v54 = vmul.f32 %v1718_v56, %v1718_v56  ;;  %2618 = vpow2.f32 %v2074_v48  ;;  %v911_v13 = vsel %vm783_vm0, %v633_v22, %v847_v18 }
 0x156   :  { %3720 = vst [vmem:[#allocation16_spill] sm:$0xff] %v3366_v58  ;;  %v3373_v11 = vpop.f32.mrb[59].mxu0  ;;  %v3375_v49 = vpop.f32.mrb[59].mxu1  ;;  %v1145_v39 = vadd.f32 1.0, %v2607_v16  ;;  %v1781_v44 = vadd.f32 %v1780_v60, %v1718_v56  ;;  %v1914_v34 = vadd.f32 %v3298_v31, %v1851_v61  ;;  %v912_v28 = vsel %vm784_vm1, %v637_v37, %v848_v14 }
 0x157   :  { %v1390_v35 = vpack.c.bf16 %v1336_v43, %v1335_v33  ;;  %v539_v9 = vadd.f32 %v3251_v51, %v2951_v45  ;;  %v655_v41 = vadd.f32 %v3113_v55, %v2951_v45  ;;  %vm761_vm2 = vcmp.ge.f32.partialorder %v523_v52, 0.0 }
 0x158   :  { %2620 = vrcp.f32 %v1145_v39  ;;  %v2609_v58 = vpop.eup %2608  ;;  %v1915_v20 = vadd.f32 %v1914_v34, %v1852_v54  ;;  %v527_v51 = vadd.f32 %v3212_v2, %v2957_v3  ;;  %v825_v14 = vmul.f32 0.2, %v523_v52 }
 0x159   :  { %v2611_v30 = vpop.eup %2610  ;;  %2412 = vst [vmem:[%s3701_s3 + $0x48] sm:$0xff] %v1390_v35   ;;  %v1719_v42 = vunpack.c.l.bf16 %v1390_v35  ;;  %v1720_v56 = vunpack.c.h.bf16 %v1390_v35  ;;  %v1146_v31 = vadd.f32 1.0, %v2609_v58  ;;  %v3389_v33 = vpop.f32.mrb[60].mxu0  ;;  %v2075_v18 = vmul.f32 -1.442695, %v539_v9 }
 0x15a   :  { %v3391_v48 = vpop.f32.mrb[60].mxu1  ;;  %v2613_v22 = vpop.eup %2612  ;;  %v1169_v37 = vadd.f32 1.0, %v2611_v30  ;;  %v643_v39 = vadd.f32 %v3079_v47, %v2957_v3  ;;  %v2098_v2 = vmul.f32 -1.442695, %v655_v41  ;;  %v659_v47 = vadd.f32 %v3120_v5, %v2951_v45 }
 0x15b   :  { %v3395_v16 = vpop.f32.mrb[61].mxu0  ;;  %v3397_v60 = vpop.f32.mrb[61].mxu1  ;;  %v1782_v61 = vadd.f32 %v1781_v44, %v1719_v42  ;;  %v1853_v58 = vmul.f32 %v1719_v42, %v1719_v42  ;;  %2622 = vrcp.f32 %v1146_v31  ;;  %v1170_v54 = vadd.f32 1.0, %v2613_v22 }
 0x15c   :  { %v3399_v55 = vpop.f32.mrb[62].mxu0  ;;  %v3401_v43 = vpop.f32.mrb[62].mxu1  ;;  %2624 = vrcp.f32 %v1169_v37  ;;  %v1854_v30 = vmul.f32 %v1720_v56, %v1720_v56  ;;  %v889_v37 = vsel %vm761_vm2, %v523_v52, %v825_v14  ;;  %vm762_vm3 = vcmp.ge.f32.partialorder %v527_v51, 0.0 }
 0x15d   :  { %3721 = vst [vmem:[#allocation17_spill] sm:$0xff] %v3401_v43  ;;  %v3405_v34 = vpop.f32.mrb[63].mxu0  ;;  %v2615_v35 = vpop.eup %2614  ;;  %v3407_v9 = vadd.f32 %v1782_v61, %v1720_v56  ;;  %v1916_v44 = vadd.f32 %v1915_v20, %v1853_v58  ;;  %2626 = vpow2.f32 %v2075_v18  ;;  %v647_v43 = vadd.f32 %v3086_v7, %v2957_v3 }
 0x15e   :  { %v3409_v42 = vpop.f32.mrb[63].mxu1  ;;  %v1359_v31 = vmul.f32 %v2615_v35, %v911_v13  ;;  %2628 = vrcp.f32 %v1170_v54  ;;  %v2617_v22 = vpop.eup %2616  ;;  %v849_v18 = vmul.f32 0.2, %v643_v39  ;;  %v2099_v61 = vmul.f32 -1.442695, %v659_v47 }
 0x15f   :  { %v3415_v41 = vadd.f32 %v1916_v44, %v1854_v30  ;;  %2630 = vpow2.f32 %v2098_v2  ;;  %v2619_v56 = vpop.eup %2618  ;;  %v1360_v20 = vmul.f32 %v2617_v22, %v912_v28  ;;  %v545_v13 = vadd.f32 %v3280_v36, %v2951_v45 }
 0x160   :  { %v826_v7 = vmul.f32 0.2, %v527_v51  ;;  %vm785_vm4 = vcmp.ge.f32.partialorder %v643_v39, 0.0  ;;  %v1147_v54 = vadd.f32 1.0, %v2619_v56  ;;  %v549_v5 = vadd.f32 %v3290_v0, %v2951_v45 }
 0x161   :  { %v3422_v35 = vpack.c.bf16 %v1360_v20, %v1359_v31  ;;  %v850_v52 = vmul.f32 0.2, %v647_v43  ;;  %2632 = vpow2.f32 %v2099_v61  ;;  %vm786_vm5 = vcmp.ge.f32.partialorder %v647_v43, 0.0 }
 0x162   :  { %v2621_v58 = vpop.eup %2620  ;;  %2634 = vrcp.f32 %v1147_v54  ;;  %v2076_v28 = vmul.f32 -1.442695, %v545_v13  ;;  %v913_v36 = vsel %vm785_vm4, %v643_v39, %v849_v18  ;;  %v2077_v14 = vmul.f32 -1.442695, %v549_v5 }
 0x163   :  { %v1337_v30 = vmul.f32 %v2621_v58, %v889_v37  ;;  %2424 = vst [vmem:[%s3701_s3 + $0xa8] sm:$0xff] %v3422_v35   ;;  %v890_v44 = vsel %vm762_vm3, %v527_v51, %v826_v7  ;;  %v533_v0 = vadd.f32 %v3233_v25, %v2957_v3  ;;  %v665_v31 = vadd.f32 %v3143_v26, %v2951_v45 }
 0x164   :  { %2636 = vpow2.f32 %v2076_v28  ;;  %v914_v37 = vsel %vm786_vm5, %v647_v43, %v850_v52  ;;  %v669_v25 = vadd.f32 %v3152_v21, %v2951_v45  ;;  %v653_v52 = vadd.f32 %v3109_v53, %v2957_v3 }
 0x165   :  { %v2623_v2 = vpop.eup %2622  ;;  %2638 = vpow2.f32 %v2077_v14  ;;  %v2100_v18 = vmul.f32 -1.442695, %v665_v31  ;;  %vm763_vm6 = vcmp.ge.f32.partialorder %v533_v0, 0.0  ;;  %v827_v51 = vmul.f32 0.2, %v533_v0 }
 0x166   :  { %v2625_v47 = vpop.eup %2624  ;;  %v1338_v22 = vmul.f32 %v2623_v2, %v890_v44  ;;  %vm787_vm8 = vcmp.ge.f32.partialorder %v653_v52, 0.0 }
 0x167   :  { %v2627_v56 = vpop.eup %2626  ;;  %v1361_v20 = vmul.f32 %v2625_v47, %v913_v36  ;;  %v891_v44 = vsel %vm763_vm6, %v533_v0, %v827_v51 }
 0x168   :  { %v2629_v61 = vpop.eup %2628  ;;  %v1391_v13 = vpack.c.bf16 %v1338_v22, %v1337_v30  ;;  %v1148_v39 = vadd.f32 1.0, %v2627_v56  ;;  %v537_v30 = vadd.f32 %v3244_v29, %v2957_v3  ;;  %v657_v29 = vadd.f32 %v3118_v6, %v2957_v3 }
 0x169   :  { %v2631_v58 = vpop.eup %2630  ;;  %v1362_v54 = vmul.f32 %v2629_v61, %v914_v37  ;;  %v543_v6 = vadd.f32 %v3276_v46, %v2957_v3  ;;  %v547_v46 = vadd.f32 %v3284_v57, %v2957_v3  ;;  %v667_v57 = vadd.f32 %v3149_v10, %v2957_v3 }
 0x16a   :  { %2413 = vst [vmem:[%s3701_s3 + $0x50] sm:$0xff] %v1391_v13   ;;  %v1721_v26 = vunpack.c.l.bf16 %v1391_v13  ;;  %v1722_v43 = vunpack.c.h.bf16 %v1391_v13  ;;  %2640 = vrcp.f32 %v1148_v39  ;;  %v1171_v7 = vadd.f32 1.0, %v2631_v58 }
 0x16b   :  { %v3438_v5 = vpack.c.bf16 %v1362_v54, %v1361_v20  ;;  %2642 = vpow2.f32 %v2100_v18  ;;  %v2633_v28 = vpop.eup %2632  ;;  %vm764_vm7 = vcmp.ge.f32.partialorder %v537_v30, 0.0  ;;  %v828_v56 = vmul.f32 0.2, %v537_v30 }
 0x16c   :  { %v1784_v21 = vadd.f32 %v3407_v9, %v1721_v26  ;;  %v1855_v36 = vmul.f32 %v1721_v26, %v1721_v26  ;;  %2644 = vrcp.f32 %v1171_v7  ;;  %v2635_v14 = vpop.eup %2634  ;;  %v1856_v2 = vmul.f32 %v1722_v43, %v1722_v43 }
 0x16d   :  { %2425 = vst [vmem:[%s3701_s3 + $0xb0] sm:$0xff] %v3438_v5   ;;  %v1172_v31 = vadd.f32 1.0, %v2633_v28  ;;  %v1339_v22 = vmul.f32 %v2635_v14, %v891_v44  ;;  %v2101_v9 = vmul.f32 -1.442695, %v669_v25  ;;  %v851_v20 = vmul.f32 0.2, %v653_v52 }
 0x16e   :  { %v1785_v53 = vadd.f32 %v1784_v21, %v1722_v43  ;;  %v1918_v47 = vadd.f32 %v3415_v41, %v1855_v36  ;;  %v2637_v37 = vpop.eup %2636  ;;  %v852_v0 = vmul.f32 0.2, %v657_v29  ;;  %v555_v18 = vadd.f32 %v3321_v32, %v2951_v45 }
 0x16f   :  { %2646 = vrcp.f32 %v1172_v31  ;;  %v1149_v13 = vadd.f32 1.0, %v2637_v37  ;;  %v2639_v39 = vpop.eup %2638  ;;  %v559_v41 = vadd.f32 %v3339_v15, %v2951_v45  ;;  %vm788_vm9 = vcmp.ge.f32.partialorder %v657_v29, 0.0 }
 0x170   :  { %v1919_v61 = vadd.f32 %v1918_v47, %v1856_v2  ;;  %2648 = vpow2.f32 %v2101_v9  ;;  %v1150_v58 = vadd.f32 1.0, %v2639_v39  ;;  %v675_v54 = vadd.f32 %v3172_v40, %v2951_v45 }
 0x171   :  { %2650 = vrcp.f32 %v1149_v13  ;;  %v892_v51 = vsel %vm764_vm7, %v537_v30, %v828_v56  ;;  %v915_v25 = vsel %vm787_vm8, %v653_v52, %v851_v20  ;;  %v2078_v26 = vmul.f32 -1.442695, %v555_v18 }
 0x172   :  { %2652 = vrcp.f32 %v1150_v58  ;;  %v2079_v7 = vmul.f32 -1.442695, %v559_v41  ;;  %v2102_v32 = vmul.f32 -1.442695, %v675_v54  ;;  %v916_v15 = vsel %vm788_vm9, %v657_v29, %v852_v0 }
 0x173   :  { %v829_v36 = vmul.f32 0.2, %v543_v6  ;;  %2654 = vpow2.f32 %v2078_v26  ;;  %v663_v40 = vadd.f32 %v3141_v50, %v2957_v3  ;;  %v679_v30 = vadd.f32 %v3181_v23, %v2951_v45 }
 0x174   :  { %v2641_v43 = vpop.eup %2640  ;;  %2656 = vpow2.f32 %v2079_v7  ;;  %vm765_vm10 = vcmp.ge.f32.partialorder %v543_v6, 0.0  ;;  %vm766_vm11 = vcmp.ge.f32.partialorder %v547_v46, 0.0  ;;  %v830_v9 = vmul.f32 0.2, %v547_v46 }
 0x175   :  { %v2643_v28 = vpop.eup %2642  ;;  %v1340_v21 = vmul.f32 %v2641_v43, %v892_v51  ;;  %2658 = vpow2.f32 %v2102_v32  ;;  %v2103_v29 = vmul.f32 -1.442695, %v679_v30  ;;  %v565_v23 = vadd.f32 %v3360_v19, %v2951_v45 }
 0x176   :  { %v2645_v14 = vpop.eup %2644  ;;  %v1173_v2 = vadd.f32 1.0, %v2643_v28  ;;  %v893_v56 = vsel %vm765_vm10, %v543_v6, %v829_v36  ;;  %vm789_vm12 = vcmp.ge.f32.partialorder %v663_v40, 0.0  ;;  %v853_v10 = vmul.f32 0.2, %v663_v40 }
 0x177   :  { %v1392_v52 = vpack.c.bf16 %v1340_v21, %v1339_v22  ;;  %v1363_v44 = vmul.f32 %v2645_v14, %v915_v25  ;;  %v854_v58 = vmul.f32 0.2, %v667_v57  ;;  %v2080_v54 = vmul.f32 -1.442695, %v565_v23 }
 0x178   :  { %2660 = vrcp.f32 %v1173_v2  ;;  %vm790_vm13 = vcmp.ge.f32.partialorder %v667_v57, 0.0  ;;  %v553_v6 = vadd.f32 %v3312_v4, %v2957_v3  ;;  %v917_v21 = vsel %vm789_vm12, %v663_v40, %v853_v10 }
 0x179   :  { %v2647_v31 = vpop.eup %2646  ;;  %2414 = vst [vmem:[%s3701_s3 + $0x58] sm:$0xff] %v1392_v52   ;;  %v1723_v50 = vunpack.c.l.bf16 %v1392_v52  ;;  %v1724_v47 = vunpack.c.h.bf16 %v1392_v52  ;;  %2662 = vpow2.f32 %v2103_v29  ;;  %v918_v2 = vsel %vm790_vm13, %v667_v57, %v854_v58 }
 0x17a   :  { %v2649_v22 = vpop.eup %2648  ;;  %v1364_v37 = vmul.f32 %v2647_v31, %v916_v15  ;;  %vm767_vm14 = vcmp.ge.f32.partialorder %v553_v6, 0.0  ;;  %v673_v57 = vadd.f32 %v3167_v27, %v2957_v3  ;;  %v689_v27 = vadd.f32 %v3222_v17, %v2951_v45 }
 0x17b   :  { %v1786_v20 = vadd.f32 %v1785_v53, %v1723_v50  ;;  %v1857_v13 = vmul.f32 %v1723_v50, %v1723_v50  ;;  %v1174_v39 = vadd.f32 1.0, %v2649_v22  ;;  %v2651_v0 = vpop.eup %2650  ;;  %v1858_v18 = vmul.f32 %v1724_v47, %v1724_v47 }
 0x17c   :  { %v3475_v41 = vpack.c.bf16 %v1364_v37, %v1363_v44  ;;  %v1341_v26 = vmul.f32 %v2651_v0, %v893_v56  ;;  %v2653_v19 = vpop.eup %2652  ;;  %v894_v53 = vsel %vm766_vm11, %v547_v46, %v830_v9  ;;  %v557_v46 = vadd.f32 %v3332_v24, %v2957_v3 }
 0x17d   :  { %v1787_v51 = vadd.f32 %v1786_v20, %v1724_v47  ;;  %v1920_v25 = vadd.f32 %v1919_v61, %v1857_v13  ;;  %2664 = vrcp.f32 %v1174_v39  ;;  %v2655_v43 = vpop.eup %2654  ;;  %v1342_v32 = vmul.f32 %v2653_v19, %v894_v53 }
 0x17e   :  { %2426 = vst [vmem:[%s3701_s3 + $0xb8] sm:$0xff] %v3475_v41   ;;  %2666 = vpow2.f32 %v2080_v54  ;;  %v569_v61 = vadd.f32 %v3373_v11, %v2951_v45  ;;  %v2657_v28 = vpop.eup %2656  ;;  %v1151_v15 = vadd.f32 1.0, %v2655_v43  ;;  %v831_v50 = vmul.f32 0.2, %v553_v6 }
 0x17f   :  { %v1921_v7 = vadd.f32 %v1920_v25, %v1858_v18  ;;  %v2659_v36 = vpop.eup %2658  ;;  %v1393_v14 = vpack.c.bf16 %v1342_v32, %v1341_v26  ;;  %v1152_v30 = vadd.f32 1.0, %v2657_v28  ;;  %v685_v24 = vadd.f32 %v3206_v12, %v2951_v45 }
 0x180   :  { %2668 = vrcp.f32 %v1151_v15  ;;  %v1175_v4 = vadd.f32 1.0, %v2659_v36  ;;  %v2081_v44 = vmul.f32 -1.442695, %v569_v61  ;;  %v832_v23 = vmul.f32 0.2, %v557_v46 }
 0x181   :  { %2415 = vst [vmem:[%s3701_s3 + $0x60] sm:$0xff] %v1393_v14   ;;  %v1725_v11 = vunpack.c.l.bf16 %v1393_v14  ;;  %v1726_v29 = vunpack.c.h.bf16 %v1393_v14  ;;  %2670 = vrcp.f32 %v1152_v30  ;;  %v677_v56 = vadd.f32 %v3176_v62, %v2957_v3 }
 0x182   :  { %v2661_v52 = vpop.eup %2660  ;;  %2672 = vrcp.f32 %v1175_v4  ;;  %v2104_v20 = vmul.f32 -1.442695, %v685_v24  ;;  %vm791_vm15 = vcmp.ge.f32.partialorder %v673_v57, 0.0  ;;  %v855_v12 = vmul.f32 0.2, %v673_v57 }
 0x183   :  { %v1365_v40 = vmul.f32 %v2661_v52, %v917_v21  ;;  %v2663_v31 = vpop.eup %2662  ;;  %v1788_v47 = vadd.f32 %v1787_v51, %v1725_v11  ;;  %v1859_v9 = vmul.f32 %v1725_v11, %v1725_v11  ;;  %v1860_v37 = vmul.f32 %v1726_v29, %v1726_v29 }
 0x184   :  { %v1176_v22 = vadd.f32 1.0, %v2663_v31  ;;  %2674 = vpow2.f32 %v2081_v44  ;;  %v2105_v51 = vmul.f32 -1.442695, %v689_v27  ;;  %v575_v62 = vadd.f32 %v3395_v16, %v2951_v45 }
 0x185   :  { %v1789_v10 = vadd.f32 %v1788_v47, %v1726_v29  ;;  %v1922_v39 = vadd.f32 %v1921_v7, %v1859_v9  ;;  %vm768_vm0 = vcmp.ge.f32.partialorder %v557_v46, 0.0  ;;  %v856_v26 = vmul.f32 0.2, %v677_v56  ;;  %v3722_v47 = vld [vmem:[#allocation6_spill] sm:$0xff] }
 0x186   :  { %2676 = vrcp.f32 %v1176_v22  ;;  %v2082_v19 = vmul.f32 -1.442695, %v575_v62  ;;  %v579_v17 = vadd.f32 %v3405_v34, %v2951_v45  ;;  %v895_v43 = vsel %vm767_vm14, %v553_v6, %v831_v50  ;;  %v2738_v6 = vld [vmem:[%s3701_s3 + $0x80] sm:$0xff] }
 0x187   :  { %v2665_v13 = vpop.eup %2664  ;;  %2678 = vpow2.f32 %v2104_v20  ;;  %v1923_v58 = vadd.f32 %v1922_v39, %v1860_v37  ;;  %v919_v7 = vsel %vm791_vm15, %v673_v57, %v855_v12  ;;  %vm792_vm1 = vcmp.ge.f32.partialorder %v677_v56, 0.0 }
 0x188   :  { %v2667_v0 = vpop.eup %2666  ;;  %v1366_v18 = vmul.f32 %v2665_v13, %v918_v2  ;;  %v896_v61 = vsel %vm768_vm0, %v557_v46, %v832_v23  ;;  %v563_v28 = vadd.f32 %v3351_v8, %v2957_v3  ;;  %v2083_v15 = vmul.f32 -1.442695, %v579_v17 }
 0x189   :  { %v1153_v54 = vadd.f32 1.0, %v2667_v0  ;;  %v920_v14 = vsel %vm792_vm1, %v677_v56, %v856_v26  ;;  %v3517_v30 = vunpack.c.l.bf16 %v2738_v6  ;;  %v695_v46 = vadd.f32 %v3246_v63, %v2951_v45 }
 0x18a   :  { %v3502_v25 = vpack.c.bf16 %v1366_v18, %v1365_v40  ;;  %v2669_v53 = vpop.eup %2668  ;;  %v3521_v8 = vunpack.c.h.bf16 %v2738_v6  ;;  %v833_v44 = vmul.f32 0.2, %v563_v28  ;;  %v567_v11 = vadd.f32 %v3364_v1, %v2957_v3  ;;  %v3723_v1 = vld [vmem:[#allocation2_spill] sm:$0xff] }
 0x18b   :  { %2680 = vrcp.f32 %v1153_v54  ;;  %v2671_v16 = vpop.eup %2670  ;;  %v1343_v32 = vmul.f32 %v2669_v53, %v895_v43  ;;  %vm769_vm2 = vcmp.ge.f32.partialorder %v563_v28, 0.0  ;;  %v2106_v63 = vmul.f32 -1.442695, %v695_v46 }
 0x18c   :  { %2427 = vst [vmem:[%s3701_s3 + $0xc0] sm:$0xff] %v3502_v25   ;;  %2682 = vpow2.f32 %v2105_v51  ;;  %v2673_v34 = vpop.eup %2672  ;;  %v1344_v21 = vmul.f32 %v2671_v16, %v896_v61  ;;  %v699_v9 = vadd.f32 %v3722_v47, %v2951_v45  ;;  %v683_v56 = vadd.f32 %v3723_v1, %v2957_v3 }
 0x18d   :  { %2684 = vpow2.f32 %v2082_v19  ;;  %v1367_v36 = vmul.f32 %v2673_v34, %v919_v7  ;;  %v897_v13 = vsel %vm769_vm2, %v563_v28, %v833_v44  ;;  %vm770_vm3 = vcmp.ge.f32.partialorder %v567_v11, 0.0  ;;  %v3725_v34 = vld [vmem:[#allocation10_spill] sm:$0xff] }
 0x18e   :  { %v2675_v2 = vpop.eup %2674  ;;  %v1394_v52 = vpack.c.bf16 %v1344_v21, %v1343_v32  ;;  %2686 = vpow2.f32 %v2083_v15  ;;  %v834_v39 = vmul.f32 0.2, %v567_v11  ;;  %v2107_v19 = vmul.f32 -1.442695, %v699_v9 }
 0x18f   :  { %v1154_v29 = vadd.f32 1.0, %v2675_v2  ;;  %v857_v53 = vmul.f32 0.2, %v683_v56  ;;  %v573_v43 = vadd.f32 %v3389_v33, %v2957_v3  ;;  %v3548_v7 = vmul.f32 %v3517_v30, %v3517_v30 }
 0x190   :  { %v2677_v4 = vpop.eup %2676  ;;  %2416 = vst [vmem:[%s3701_s3 + $0x68] sm:$0xff] %v1394_v52   ;;  %v1727_v31 = vunpack.c.l.bf16 %v1394_v52  ;;  %v1728_v50 = vunpack.c.h.bf16 %v1394_v52  ;;  %vm793_vm4 = vcmp.ge.f32.partialorder %v683_v56, 0.0  ;;  %v705_v16 = vadd.f32 %v3282_v38, %v2951_v45 }
 0x191   :  { %v2679_v40 = vpop.eup %2678  ;;  %v1368_v57 = vmul.f32 %v2677_v4, %v920_v14  ;;  %2688 = vrcp.f32 %v1154_v29  ;;  %v898_v61 = vsel %vm770_vm3, %v567_v11, %v834_v39  ;;  %v709_v28 = vadd.f32 %v3292_v59, %v2951_v45  ;;  %v3726_v4 = vld [vmem:[#allocation12_spill] sm:$0xff] }
 0x192   :  { %v1177_v24 = vadd.f32 1.0, %v2679_v40  ;;  %v1790_v23 = vadd.f32 %v1789_v10, %v1727_v31  ;;  %v1861_v22 = vmul.f32 %v1727_v31, %v1727_v31  ;;  %v1862_v18 = vmul.f32 %v1728_v50, %v1728_v50  ;;  %v3724_v10 = vld [vmem:[#allocation3_spill] sm:$0xff]  ;;  %v3727_v31 = vld [vmem:[#allocation4_spill] sm:$0xff] }
 0x193   :  { %v3530_v37 = vpack.c.bf16 %v1368_v57, %v1367_v36  ;;  %v687_v54 = vadd.f32 %v3724_v10, %v2957_v3  ;;  %v715_v33 = vadd.f32 %v3725_v34, %v2951_v45  ;;  %v2108_v36 = vmul.f32 -1.442695, %v705_v16 }
 0x194   :  { %2690 = vrcp.f32 %v1177_v24  ;;  %v3534_v0 = vadd.f32 %v1790_v23, %v1728_v50  ;;  %v1924_v12 = vadd.f32 %v1923_v58, %v1861_v22  ;;  %v921_v14 = vsel %vm793_vm4, %v683_v56, %v857_v53  ;;  %v3729_v22 = vld [vmem:[#allocation15_spill] sm:$0xff] }
 0x195   :  { %v2681_v20 = vpop.eup %2680  ;;  %2428 = vst [vmem:[%s3701_s3 + $0xc8] sm:$0xff] %v3530_v37   ;;  %2692 = vpow2.f32 %v2106_v63  ;;  %v858_v21 = vmul.f32 0.2, %v687_v54  ;;  %vm794_vm5 = vcmp.ge.f32.partialorder %v687_v54, 0.0  ;;  %v835_v2 = vmul.f32 0.2, %v573_v43 }
 0x196   :  { %v2683_v27 = vpop.eup %2682  ;;  %v1345_v62 = vmul.f32 %v2681_v20, %v897_v13  ;;  %v3542_v17 = vadd.f32 %v1924_v12, %v1862_v18  ;;  %v2109_v6 = vmul.f32 -1.442695, %v709_v28  ;;  %v577_v38 = vadd.f32 %v3399_v55, %v2957_v3  ;;  %v3728_v63 = vld [vmem:[#allocation5_spill] sm:$0xff]  ;;  %v3730_v12 = vld [vmem:[#allocation7_spill] sm:$0xff] }
 0x197   :  { %v2685_v51 = vpop.eup %2684  ;;  %v1178_v26 = vadd.f32 1.0, %v2683_v27  ;;  %v2110_v46 = vmul.f32 -1.442695, %v715_v33  ;;  %v719_v59 = vadd.f32 %v3726_v4, %v2951_v45  ;;  %v3563_v44 = vmul.f32 %v3521_v8, %v3521_v8 }
 0x198   :  { %v1155_v58 = vadd.f32 1.0, %v2685_v51  ;;  %v2687_v32 = vpop.eup %2686  ;;  %vm771_vm6 = vcmp.ge.f32.partialorder %v573_v43, 0.0  ;;  %v922_v40 = vsel %vm794_vm5, %v687_v54, %v858_v21  ;;  %v693_v50 = vadd.f32 %v3727_v31, %v2957_v3  ;;  %v2739_v21 = vld [vmem:[%s3701_s3 + $0x88] sm:$0xff]  ;;  %v3732_v31 = vld [vmem:[#allocation9_spill] sm:$0xff] }
 0x199   :  { %2694 = vrcp.f32 %v1178_v26  ;;  %v1156_v15 = vadd.f32 1.0, %v2687_v32  ;;  %v2111_v57 = vmul.f32 -1.442695, %v719_v59  ;;  %v697_v47 = vadd.f32 %v3728_v63, %v2957_v3 }
 0x19a   :  { %2696 = vrcp.f32 %v1155_v58  ;;  %v899_v23 = vsel %vm771_vm6, %v573_v43, %v835_v2  ;;  %vm772_vm7 = vcmp.ge.f32.partialorder %v577_v38, 0.0  ;;  %v725_v1 = vadd.f32 %v3729_v22, %v2951_v45  ;;  %v3733_v22 = vld [vmem:[#allocation11_spill] sm:$0xff] }
 0x19b   :  { %2698 = vpow2.f32 %v2107_v19  ;;  %v2689_v52 = vpop.eup %2688  ;;  %v836_v13 = vmul.f32 0.2, %v577_v38  ;;  %vm795_vm8 = vcmp.ge.f32.partialorder %v693_v50, 0.0  ;;  %v859_v18 = vmul.f32 0.2, %v693_v50 }
 0x19c   :  { %2700 = vrcp.f32 %v1156_v15  ;;  %v1346_v11 = vmul.f32 %v2689_v52, %v898_v61  ;;  %v3576_v10 = vadd.f32 %v3730_v12, %v2957_v3  ;;  %v2112_v54 = vmul.f32 -1.442695, %v725_v1 }
 0x19d   :  { %2702 = vpow2.f32 %v2108_v36  ;;  %v860_v53 = vmul.f32 0.2, %v697_v47  ;;  %vm796_vm9 = vcmp.ge.f32.partialorder %v697_v47, 0.0  ;;  %v900_v15 = vsel %vm772_vm7, %v577_v38, %v836_v13 }
 0x19e   :  { %v2691_v29 = vpop.eup %2690  ;;  %2704 = vpow2.f32 %v2109_v6  ;;  %v1395_v55 = vpack.c.bf16 %v1346_v11, %v1345_v62  ;;  %v729_v36 = vadd.f32 %v3375_v49, %v2951_v45  ;;  %v923_v6 = vsel %vm795_vm8, %v693_v50, %v859_v18  ;;  %v3731_v11 = vld [vmem:[#allocation8_spill] sm:$0xff] }
 0x19f   :  { %v1369_v24 = vmul.f32 %v2691_v29, %v921_v14  ;;  %2706 = vpow2.f32 %v2110_v46  ;;  %v2693_v9 = vpop.eup %2692  ;;  %v924_v52 = vsel %vm796_vm9, %v697_v47, %v860_v53  ;;  %vm797_vm10 = vcmp.ge.f32.partialorder %v3576_v10, 0.0 }
 0x1a0   :  { %2708 = vpow2.f32 %v2111_v57  ;;  %2417 = vst [vmem:[%s3701_s3 + $0x70] sm:$0xff] %v1395_v55   ;;  %v1729_v56 = vunpack.c.l.bf16 %v1395_v55  ;;  %v1730_v20 = vunpack.c.h.bf16 %v1395_v55  ;;  %v1179_v39 = vadd.f32 1.0, %v2693_v9 }
 0x1a1   :  { %v861_v38 = vmul.f32 0.2, %v3576_v10  ;;  %v707_v29 = vadd.f32 %v3731_v11, %v2957_v3  ;;  %v713_v57 = vadd.f32 %v3732_v31, %v2957_v3  ;;  %v735_v63 = vadd.f32 %v3397_v60, %v2951_v45  ;;  %v2741_v31 = vld [vmem:[%s3701_s3 + $0x98] sm:$0xff] }
 0x1a2   :  { %v1792_v62 = vadd.f32 %v3534_v0, %v1729_v56  ;;  %v1863_v26 = vmul.f32 %v1729_v56, %v1729_v56  ;;  %v1864_v58 = vmul.f32 %v1730_v20, %v1730_v20  ;;  %2710 = vrcp.f32 %v1179_v39 }
 0x1a3   :  { %v2695_v27 = vpop.eup %2694  ;;  %v3585_v0 = vunpack.c.l.bf16 %v2739_v21  ;;  %2712 = vpow2.f32 %v2112_v54  ;;  %v717_v1 = vadd.f32 %v3733_v22, %v2957_v3  ;;  %v2114_v56 = vmul.f32 -1.442695, %v735_v63 }
 0x1a4   :  { %v2697_v51 = vpop.eup %2696  ;;  %v1370_v19 = vmul.f32 %v2695_v27, %v922_v40  ;;  %v1793_v32 = vadd.f32 %v1792_v62, %v1730_v20  ;;  %v1926_v61 = vadd.f32 %v3542_v17, %v1863_v26  ;;  %v739_v20 = vadd.f32 %v3409_v42, %v2951_v45 }
 0x1a5   :  { %v2699_v43 = vpop.eup %2698  ;;  %v1347_v16 = vmul.f32 %v2697_v51, %v899_v23  ;;  %vm798_vm11 = vcmp.ge.f32.partialorder %v707_v29, 0.0  ;;  %v862_v18 = vmul.f32 0.2, %v707_v29  ;;  %vm799_vm12 = vcmp.ge.f32.partialorder %v713_v57, 0.0 }
 0x1a6   :  { %v3580_v28 = vpack.c.bf16 %v1370_v19, %v1369_v24  ;;  %v1180_v34 = vadd.f32 1.0, %v2699_v43  ;;  %v2701_v33 = vpop.eup %2700  ;;  %v1927_v2 = vadd.f32 %v1926_v61, %v1864_v58  ;;  %v2113_v24 = vmul.f32 -1.442695, %v729_v36 }
 0x1a7   :  { %v2703_v14 = vpop.eup %2702  ;;  %v1348_v17 = vmul.f32 %v2701_v33, %v900_v15  ;;  %v2115_v12 = vmul.f32 -1.442695, %v739_v20  ;;  %v863_v19 = vmul.f32 0.2, %v713_v57  ;;  %v864_v53 = vmul.f32 0.2, %v717_v1 }
 0x1a8   :  { %2429 = vst [vmem:[%s3701_s3 + $0xd0] sm:$0xff] %v3580_v28   ;;  %v2705_v46 = vpop.eup %2704  ;;  %2714 = vrcp.f32 %v1180_v34  ;;  %v1181_v4 = vadd.f32 1.0, %v2703_v14  ;;  %vm800_vm13 = vcmp.ge.f32.partialorder %v717_v1, 0.0  ;;  %v926_v61 = vsel %vm798_vm11, %v707_v29, %v862_v18  ;;  %v3734_v34 = vld [vmem:[#allocation13_spill] sm:$0xff] }
 0x1a9   :  { %v2707_v49 = vpop.eup %2706  ;;  %v1396_v59 = vpack.c.bf16 %v1348_v17, %v1347_v16  ;;  %v1182_v40 = vadd.f32 1.0, %v2705_v46  ;;  %v1736_v16 = vunpack.c.h.bf16 %v2739_v21  ;;  %v723_v33 = vadd.f32 %v3734_v34, %v2957_v3  ;;  %v2740_v21 = vld [vmem:[%s3701_s3 + $0x90] sm:$0xff] }
 0x1aa   :  { %v2709_v55 = vpop.eup %2708  ;;  %2716 = vrcp.f32 %v1181_v4  ;;  %v1183_v50 = vadd.f32 1.0, %v2707_v49  ;;  %v927_v17 = vsel %vm799_vm12, %v713_v57, %v863_v19  ;;  %v1739_v57 = vunpack.c.l.bf16 %v2741_v31 }
 0x1ab   :  { %2418 = vst [vmem:[%s3701_s3 + $0x78] sm:$0xff] %v1396_v59   ;;  %v1731_v47 = vunpack.c.l.bf16 %v1396_v59  ;;  %v1732_v9 = vunpack.c.h.bf16 %v1396_v59  ;;  %2718 = vrcp.f32 %v1182_v40  ;;  %v1184_v23 = vadd.f32 1.0, %v2709_v55 }
 0x1ac   :  { %2720 = vrcp.f32 %v1183_v50  ;;  %v2711_v60 = vpop.eup %2710  ;;  %v1870_v49 = vmul.f32 %v1736_v16, %v1736_v16  ;;  %v1738_v59 = vunpack.c.h.bf16 %v2740_v21  ;;  %v865_v29 = vmul.f32 0.2, %v723_v33 }
 0x1ad   :  { %v1794_v13 = vadd.f32 %v1793_v32, %v1731_v47  ;;  %v1865_v39 = vmul.f32 %v1731_v47, %v1731_v47  ;;  %2722 = vrcp.f32 %v1184_v23  ;;  %v1866_v27 = vmul.f32 %v1732_v9, %v1732_v9  ;;  %v2713_v26 = vpop.eup %2712 }
 0x1ae   :  { %2724 = vpow2.f32 %v2113_v24  ;;  %v1371_v62 = vmul.f32 %v2711_v60, %v923_v6  ;;  %v1185_v43 = vadd.f32 1.0, %v2713_v26  ;;  %v925_v32 = vsel %vm797_vm10, %v3576_v10, %v861_v38  ;;  %v3735_v26 = vld [vmem:[#allocation14_spill] sm:$0xff] }
 0x1af   :  { %v1795_v54 = vadd.f32 %v1794_v13, %v1732_v9  ;;  %v1928_v51 = vadd.f32 %v1927_v2, %v1865_v39  ;;  %2726 = vpow2.f32 %v2114_v56  ;;  %v1869_v2 = vmul.f32 %v3585_v0, %v3585_v0 }
 0x1b0   :  { %2728 = vpow2.f32 %v2115_v12  ;;  %v1737_v10 = vunpack.c.l.bf16 %v2740_v21  ;;  %v928_v6 = vsel %vm800_vm13, %v717_v1, %v864_v53  ;;  %vm801_vm14 = vcmp.ge.f32.partialorder %v723_v33, 0.0 }
 0x1b1   :  { %v1796_v45 = vadd.f32 %v1795_v54, %v3517_v30  ;;  %v1929_v42 = vadd.f32 %v1928_v51, %v1866_v27  ;;  %2730 = vrcp.f32 %v1185_v43  ;;  %v1872_v20 = vmul.f32 %v1738_v59, %v1738_v59  ;;  %v3736_v43 = vld [vmem:[#allocation16_spill] sm:$0xff] }
 0x1b2   :  { %v2715_v58 = vpop.eup %2714  ;;  %v1871_v23 = vmul.f32 %v1737_v10, %v1737_v10  ;;  %v929_v39 = vsel %vm801_vm14, %v723_v33, %v865_v29  ;;  %v1873_v51 = vmul.f32 %v1739_v57, %v1739_v57  ;;  %v1741_v19 = vunpack.c.l.bf16 %v3735_v26 }
 0x1b3   :  { %v1797_v15 = vadd.f32 %v1796_v45, %v3521_v8  ;;  %v1930_v36 = vadd.f32 %v1929_v42, %v3548_v7  ;;  %v1372_v14 = vmul.f32 %v2715_v58, %v924_v52  ;;  %v727_v58 = vadd.f32 %v3736_v43, %v2957_v3 }
 0x1b4   :  { %v2717_v30 = vpop.eup %2716 }
 0x1b5   :  { %v2719_v46 = vpop.eup %2718  ;;  %v1798_v8 = vadd.f32 %v1797_v15, %v3585_v0  ;;  %v1931_v7 = vadd.f32 %v1930_v36, %v3563_v44  ;;  %v3629_v52 = vpack.c.bf16 %v1372_v14, %v1371_v62  ;;  %v1373_v38 = vmul.f32 %v2717_v30, %v925_v32  ;;  %v3737_v15 = vld [vmem:[#allocation17_spill] sm:$0xff] }
 0x1b6   :  { %v2721_v4 = vpop.eup %2720  ;;  %v1374_v11 = vmul.f32 %v2719_v46, %v926_v61  ;;  %v1740_v0 = vunpack.c.h.bf16 %v2741_v31  ;;  %v733_v61 = vadd.f32 %v3391_v48, %v2957_v3  ;;  %v737_v36 = vadd.f32 %v3737_v15, %v2957_v3 }
 0x1b7   :  { %v2723_v40 = vpop.eup %2722  ;;  %v1799_v55 = vadd.f32 %v1798_v8, %v1736_v16  ;;  %v1932_v50 = vadd.f32 %v1931_v7, %v1869_v2  ;;  %2430 = vst [vmem:[%s3701_s3 + $0xd8] sm:$0xff] %v3629_v52   ;;  %v1375_v63 = vmul.f32 %v2721_v4, %v927_v17  ;;  %v1742_v16 = vunpack.c.h.bf16 %v3735_v26 }
 0x1b8   :  { %v2725_v44 = vpop.eup %2724  ;;  %v3638_v24 = vpack.c.bf16 %v1374_v11, %v1373_v38  ;;  %v1376_v47 = vmul.f32 %v2723_v40, %v928_v6  ;;  %v1874_v62 = vmul.f32 %v1740_v0, %v1740_v0  ;;  %v1875_v14 = vmul.f32 %v1741_v19, %v1741_v19 }
 0x1b9   :  { %v2727_v9 = vpop.eup %2726  ;;  %v1800_v22 = vadd.f32 %v1799_v55, %v1737_v10  ;;  %v1933_v1 = vadd.f32 %v1932_v50, %v1870_v49  ;;  %v1186_v60 = vadd.f32 1.0, %v2725_v44  ;;  %v1743_v30 = vunpack.c.l.bf16 %v3422_v35 }
 0x1ba   :  { %v2729_v56 = vpop.eup %2728  ;;  %2431 = vst [vmem:[%s3701_s3 + $0xe0] sm:$0xff] %v3638_v24   ;;  %v3644_v13 = vpack.c.bf16 %v1376_v47, %v1375_v63  ;;  %v1187_v12 = vadd.f32 1.0, %v2727_v9  ;;  %v866_v10 = vmul.f32 0.2, %v727_v58  ;;  %v1876_v17 = vmul.f32 %v1742_v16, %v1742_v16 }
 0x1bb   :  { %v1801_v27 = vadd.f32 %v1800_v22, %v1738_v59  ;;  %v1934_v18 = vadd.f32 %v1933_v1, %v1871_v23  ;;  %v1188_v54 = vadd.f32 1.0, %v2729_v56  ;;  %v2731_v53 = vpop.eup %2730  ;;  %2732 = vrcp.f32 %v1186_v60 }
 0x1bc   :  { %2432 = vst [vmem:[%s3701_s3 + $0xe8] sm:$0xff] %v3644_v13   ;;  %v1377_v32 = vmul.f32 %v2731_v53, %v929_v39  ;;  %2734 = vrcp.f32 %v1187_v12  ;;  %v1744_v6 = vunpack.c.h.bf16 %v3422_v35  ;;  %vm802_vm15 = vcmp.ge.f32.partialorder %v727_v58, 0.0 }
 0x1bd   :  { %v1802_v45 = vadd.f32 %v1801_v27, %v1739_v57  ;;  %v1935_v42 = vadd.f32 %v1934_v18, %v1872_v20  ;;  %2736 = vrcp.f32 %v1188_v54  ;;  %v867_v46 = vmul.f32 0.2, %v733_v61 }
 0x1be   :  { %vm803_vm0 = vcmp.ge.f32.partialorder %v733_v61, 0.0  ;;  %v868_v7 = vmul.f32 0.2, %v737_v36  ;;  %v1745_v38 = vunpack.c.l.bf16 %v3438_v5  ;;  %vm804_vm1 = vcmp.ge.f32.partialorder %v737_v36, 0.0 }
 0x1bf   :  { %v1803_v34 = vadd.f32 %v1802_v45, %v1740_v0  ;;  %v1936_v33 = vadd.f32 %v1935_v42, %v1873_v51  ;;  %v1877_v3 = vmul.f32 %v1743_v30, %v1743_v30  ;;  %v930_v59 = vsel %vm802_vm15, %v727_v58, %v866_v10 }
 0x1c0   :  { %v1878_v11 = vmul.f32 %v1744_v6, %v1744_v6  ;;  %v931_v29 = vsel %vm803_vm0, %v733_v61, %v867_v46  ;;  %v1746_v31 = vunpack.c.h.bf16 %v3438_v5  ;;  %v932_v55 = vsel %vm804_vm1, %v737_v36, %v868_v7 }
 0x1c1   :  { %v1804_v2 = vadd.f32 %v1803_v34, %v1741_v19  ;;  %v1937_v21 = vadd.f32 %v1936_v33, %v1874_v62  ;;  %v1879_v44 = vmul.f32 %v1745_v38, %v1745_v38  ;;  %v1747_v47 = vunpack.c.l.bf16 %v3475_v41 }
 0x1c2   :  { %v1880_v20 = vmul.f32 %v1746_v31, %v1746_v31  ;;  %v1748_v39 = vunpack.c.h.bf16 %v3475_v41  ;;  %v1749_v12 = vunpack.c.l.bf16 %v3502_v25  ;;  %v1750_v62 = vunpack.c.h.bf16 %v3502_v25 }
 0x1c3   :  { %v1805_v8 = vadd.f32 %v1804_v2, %v1742_v16  ;;  %v1938_v48 = vadd.f32 %v1937_v21, %v1875_v14  ;;  %v1881_v18 = vmul.f32 %v1747_v47, %v1747_v47  ;;  %v1751_v45 = vunpack.c.l.bf16 %v3530_v37 }
 0x1c4   :  { %v1882_v41 = vmul.f32 %v1748_v39, %v1748_v39  ;;  %v1883_v53 = vmul.f32 %v1749_v12, %v1749_v12  ;;  %v1884_v58 = vmul.f32 %v1750_v62, %v1750_v62  ;;  %v1752_v16 = vunpack.c.h.bf16 %v3530_v37 }
 0x1c5   :  { %v1806_v4 = vadd.f32 %v1805_v8, %v1743_v30  ;;  %v1939_v49 = vadd.f32 %v1938_v48, %v1876_v17  ;;  %v2733_v40 = vpop.eup %2732  ;;  %v1885_v34 = vmul.f32 %v1751_v45, %v1751_v45  ;;  %v1753_v33 = vunpack.c.l.bf16 %v3580_v28 }
 0x1c6   :  { %v2735_v50 = vpop.eup %2734  ;;  %v1378_v0 = vmul.f32 %v2733_v40, %v930_v59  ;;  %v1886_v14 = vmul.f32 %v1752_v16, %v1752_v16  ;;  %v1754_v25 = vunpack.c.h.bf16 %v3580_v28  ;;  %v1755_v10 = vunpack.c.l.bf16 %v3629_v52 }
 0x1c7   :  { %v1940_v57 = vadd.f32 %v1939_v49, %v1877_v3  ;;  %v1807_v35 = vadd.f32 %v1806_v4, %v1744_v6  ;;  %v2737_v63 = vpop.eup %2736  ;;  %v1379_v22 = vmul.f32 %v2735_v50, %v931_v29  ;;  %v1887_v21 = vmul.f32 %v1753_v33, %v1753_v33 }
 0x1c8   :  { %v3663_v1 = vpack.c.bf16 %v1378_v0, %v1377_v32  ;;  %v1380_v56 = vmul.f32 %v2737_v63, %v932_v55  ;;  %v1888_v46 = vmul.f32 %v1754_v25, %v1754_v25  ;;  %v1756_v37 = vunpack.c.h.bf16 %v3629_v52 }
 0x1c9   :  { %v1808_v9 = vadd.f32 %v1807_v35, %v1745_v38  ;;  %v1941_v23 = vadd.f32 %v1940_v57, %v1878_v11  ;;  %v1889_v38 = vmul.f32 %v1755_v10, %v1755_v10  ;;  %v1757_v4 = vunpack.c.l.bf16 %v3638_v24 }
 0x1ca   :  { %2433 = vst [vmem:[%s3701_s3 + $0xf0] sm:$0xff] %v3663_v1   ;;  %v3670_v27 = vpack.c.bf16 %v1380_v56, %v1379_v22  ;;  %v1890_v59 = vmul.f32 %v1756_v37, %v1756_v37  ;;  %v1758_v11 = vunpack.c.h.bf16 %v3638_v24  ;;  %v1759_v57 = vunpack.c.l.bf16 %v3644_v13 }
 0x1cb   :  { %v1809_v60 = vadd.f32 %v1808_v9, %v1746_v31  ;;  %v1942_v5 = vadd.f32 %v1941_v23, %v1879_v44  ;;  %v1891_v31 = vmul.f32 %v1757_v4, %v1757_v4  ;;  %v1760_v50 = vunpack.c.h.bf16 %v3644_v13 }
 0x1cc   :  { %2434 = vst [vmem:[%s3701_s3 + $0xf8] sm:$0xff] %v3670_v27   ;;  %v1892_v55 = vmul.f32 %v1758_v11, %v1758_v11  ;;  %v1893_v63 = vmul.f32 %v1759_v57, %v1759_v57  ;;  %v1762_v24 = vunpack.c.h.bf16 %v3663_v1  ;;  %v1764_v13 = vunpack.c.h.bf16 %v3670_v27 }
 0x1cd   :  { %v1810_v54 = vadd.f32 %v1809_v60, %v1747_v47  ;;  %v1943_v51 = vadd.f32 %v1942_v5, %v1880_v20  ;;  %v1761_v47 = vunpack.c.l.bf16 %v3663_v1  ;;  %v1894_v23 = vmul.f32 %v1760_v50, %v1760_v50 }
 0x1ce   :  { %v1763_v60 = vunpack.c.l.bf16 %v3670_v27 }
 0x1cf   :  { %v1811_v26 = vadd.f32 %v1810_v54, %v1748_v39  ;;  %v1944_v19 = vadd.f32 %v1943_v51, %v1881_v18  ;;  %v1895_v39 = vmul.f32 %v1761_v47, %v1761_v47  ;;  %v1896_v18 = vmul.f32 %v1762_v24, %v1762_v24 }
 0x1d1   :  { %v1812_v42 = vadd.f32 %v1811_v26, %v1749_v12  ;;  %v1945_v43 = vadd.f32 %v1944_v19, %v1882_v41  ;;  %v1897_v41 = vmul.f32 %v1763_v60, %v1763_v60  ;;  %v1898_v26 = vmul.f32 %v1764_v13, %v1764_v13 }
 0x1d3   :  { %v1813_v32 = vadd.f32 %v1812_v42, %v1750_v62  ;;  %v1946_v61 = vadd.f32 %v1945_v43, %v1883_v53 }
 0x1d5   :  { %v1814_v15 = vadd.f32 %v1813_v32, %v1751_v45  ;;  %v1947_v36 = vadd.f32 %v1946_v61, %v1884_v58 }
 0x1d7   :  { %v1815_v30 = vadd.f32 %v1814_v15, %v1752_v16  ;;  %v1948_v2 = vadd.f32 %v1947_v36, %v1885_v34 }
 0x1d9   :  { %v1816_v17 = vadd.f32 %v1815_v30, %v1753_v33  ;;  %v1949_v6 = vadd.f32 %v1948_v2, %v1886_v14 }
 0x1db   :  { %v1817_v8 = vadd.f32 %v1816_v17, %v1754_v25  ;;  %v1950_v48 = vadd.f32 %v1949_v6, %v1887_v21 }
 0x1dd   :  { %v1818_v7 = vadd.f32 %v1817_v8, %v1755_v10  ;;  %v1951_v3 = vadd.f32 %v1950_v48, %v1888_v46 }
 0x1df   :  { %v1819_v49 = vadd.f32 %v1818_v7, %v1756_v37  ;;  %v1952_v28 = vadd.f32 %v1951_v3, %v1889_v38 }
 0x1e1   :  { %v1953_v29 = vadd.f32 %v1952_v28, %v1890_v59  ;;  %v1820_v40 = vadd.f32 %v1819_v49, %v1757_v4 }
 0x1e3   :  { %v1821_v35 = vadd.f32 %v1820_v40, %v1758_v11  ;;  %v1954_v52 = vadd.f32 %v1953_v29, %v1891_v31 }
 0x1e5   :  { %v1955_v44 = vadd.f32 %v1954_v52, %v1892_v55  ;;  %v1822_v0 = vadd.f32 %v1821_v35, %v1759_v57 }
 0x1e7   :  { %v1823_v9 = vadd.f32 %v1822_v0, %v1760_v50  ;;  %v1956_v22 = vadd.f32 %v1955_v44, %v1893_v63 }
 0x1e9   :  { %v1957_v56 = vadd.f32 %v1956_v22, %v1894_v23  ;;  %v1824_v20 = vadd.f32 %v1823_v9, %v1761_v47 }
 0x1eb   :  { %v1825_v5 = vadd.f32 %v1824_v20, %v1762_v24  ;;  %v1958_v12 = vadd.f32 %v1957_v56, %v1895_v39 }
 0x1ed   :  { %v1959_v54 = vadd.f32 %v1958_v12, %v1896_v18  ;;  %v1826_v51 = vadd.f32 %v1825_v5, %v1763_v60 }
 0x1ef   :  { %v1827_v62 = vadd.f32 %v1826_v51, %v1764_v13  ;;  %v1960_v19 = vadd.f32 %v1959_v54, %v1897_v41 }
 0x1f1   :  { %v1828_v53 = vrot.slane %v1827_v62, 4  ;;  %v1961_v45 = vadd.f32 %v1960_v19, %v1898_v26 }
 0x1f3   :  { %v1829_v42 = vadd.f32 %v1828_v53, %v1827_v62  ;;  %v1962_v1 = vrot.slane %v1961_v45, 4 }
 0x1f5   :  { %v1830_v43 = vrot.slane %v1829_v42, 2  ;;  %v1963_v58 = vadd.f32 %v1962_v1, %v1961_v45 }
 0x1f7   :  { %v1831_v16 = vadd.f32 %v1830_v43, %v1829_v42  ;;  %v1964_v32 = vrot.slane %v1963_v58, 2 }
 0x1f9   :  { %v1832_v61 = vrot.slane %v1831_v16, 1  ;;  %v1965_v34 = vadd.f32 %v1964_v32, %v1963_v58 }
 0x1fb   :  { %v1833_v33 = vadd.f32 %v1832_v61, %v1831_v16  ;;  %v1966_v15 = vrot.slane %v1965_v34, 1 }
 0x1fd   :  { %1834 = vst [vmem:[%s3702_s4] sm:$0x1] %v1833_v33  ;;  %v1967_v27 = vadd.f32 %v1966_v15, %v1965_v34 }
 0x1ff   :  { %1968 = vst [vmem:[%s3703_s5] sm:$0x1] %v1967_v27 }

</bundles_post_ra>
